<compile_context>
chip_gen: v6e
topology: v6e:2x2x1
jax: 0.10.0
libtpu: 0.0.40
codegen_flags: <defaults>
</compile_context>

<pallas_src>
import jax
import jax.numpy as jnp
from jax import lax
from jax.experimental import pallas as pl
from jax.experimental.pallas import tpu as pltpu

IN_DIM = 19
HID = 256


def mlp_kernel(x_ref, w1_ref, b1_ref, w2_ref, b2_ref, w3_ref, b3_ref,
               w4_ref, b4_ref, o_ref):
    # x_ref:  (tb, 19) f32, native row-major batch layout
    # w1_ref: (256, 19) f32; w2/w3_ref: (256, 256) f32 or bf16
    # b1/b2/b3_ref: (256, 1) f32; w4_ref: (256, 1) f32; b4_ref: (1, 1) f32
    # o_ref:  (1, tb) f32  -- lane-dense output row (batch along lanes)

    # Layer 1: contract x's last axis -> feature-major (256, tb), f32 MXU acc.
    h = lax.dot_general(w1_ref[...], x_ref[...],
                        dimension_numbers=(((1,), (1,)), ((), ())),
                        preferred_element_type=jnp.float32)
    h = jnp.maximum(h + b1_ref[...], 0.0)

    # Layer 2: (256,256) @ (256,tb); operands may be bf16, accumulate in f32.
    h = jnp.dot(w2_ref[...], h.astype(w2_ref.dtype),
                preferred_element_type=jnp.float32)
    h = jnp.maximum(h + b2_ref[...], 0.0)

    # Layer 3: (256,256) @ (256,tb)
    h = jnp.dot(w3_ref[...], h.astype(w3_ref.dtype),
                preferred_element_type=jnp.float32)
    h = jnp.maximum(h + b3_ref[...], 0.0)

    # Layer 4 (256 -> 1): VPU multiply + sublane reduce; keeps MXU free and
    # the result is already the lane-dense (1, tb) row.
    o_ref[...] = jnp.sum(h * w4_ref[...], axis=0, keepdims=True) + b4_ref[...]


def _choose_tb(B, tb_cap=2048, min_tiles=2):
    """Pick the batch tile (multiple of 256).

    - Cap at tb_cap (2048 keeps VMEM comfortably under 32 MiB; safe for v7x's
      64 MiB physical VMEM; may be raised on v5e/v6e with a bigger limit).
    - Size the grid to have >= min_tiles steps when the batch allows, so both
      v7x TensorCores are used under dimension_semantics=("parallel",).
    """
    up = lambda n: -(-n // 256) * 256
    b_pad0 = up(B)
    if b_pad0 <= 256:
        return 256
    n_tiles = max(min_tiles, -(-b_pad0 // tb_cap))
    return min(tb_cap, up(-(-B // n_tiles)))


def mlp_forward(x, params, *, tb=None, use_bf16=True, vmem_limit_bytes=None):
    """Fused MLP forward. x: (B, 19) f32 -> (B, 1) f32."""
    B, F = x.shape
    assert F == IN_DIM
    w1, b1, w2, b2, w3, b3, w4, b4 = params  # W: (out,in), b: (out,1)

    if tb is None:
        tb = _choose_tb(B)
    num_tiles = -(-B // tb)
    B_pad = num_tiles * tb
    if vmem_limit_bytes is None:
        vmem_limit_bytes = (64 if tb > 2048 else 32) * 1024 * 1024

    # Native layout; pad ragged batch with zero rows (sliced off afterwards).
    xp = x.astype(jnp.float32)
    if B_pad != B:
        xp = jnp.pad(xp, ((0, B_pad - B), (0, 0)))

    hidden_dtype = jnp.bfloat16 if use_bf16 else jnp.float32
    w1f = w1.astype(jnp.float32)          # layer 1 stays f32 (raw features)
    b1f = b1.astype(jnp.float32)
    w2c = w2.astype(hidden_dtype)
    b2f = b2.astype(jnp.float32)
    w3c = w3.astype(hidden_dtype)
    b3f = b3.astype(jnp.float32)
    w4_col = w4.reshape(HID, 1).astype(jnp.float32)   # (256, 1)
    b4_s = b4.reshape(1, 1).astype(jnp.float32)

    flops = 2 * B_pad * (IN_DIM * HID + HID * HID + HID * HID + HID)
    bytes_accessed = int(
        xp.size * xp.dtype.itemsize
        + sum(int(p.size) * p.dtype.itemsize
              for p in (w1f, b1f, w2c, b2f, w3c, b3f, w4_col, b4_s))
        + B_pad * 4)

    out = pl.pallas_call(
        mlp_kernel,
        out_shape=jax.ShapeDtypeStruct((1, B_pad), jnp.float32),
        grid=(num_tiles,),
        in_specs=[
            pl.BlockSpec((tb, IN_DIM), lambda i: (i, 0)),    # x tile (native)
            pl.BlockSpec((HID, IN_DIM), lambda i: (0, 0)),   # w1 (resident)
            pl.BlockSpec((HID, 1), lambda i: (0, 0)),        # b1
            pl.BlockSpec((HID, HID), lambda i: (0, 0)),      # w2
            pl.BlockSpec((HID, 1), lambda i: (0, 0)),        # b2
            pl.BlockSpec((HID, HID), lambda i: (0, 0)),      # w3
            pl.BlockSpec((HID, 1), lambda i: (0, 0)),        # b3
            pl.BlockSpec((HID, 1), lambda i: (0, 0)),        # w4 column
            pl.BlockSpec((1, 1), lambda i: (0, 0)),          # b4
        ],
        out_specs=pl.BlockSpec((1, tb), lambda i: (0, i)),   # lane-dense row
        compiler_params=pltpu.CompilerParams(
            dimension_semantics=("parallel",),
            vmem_limit_bytes=vmem_limit_bytes),
        cost_estimate=pl.CostEstimate(flops=flops, transcendentals=0,
                                      bytes_accessed=bytes_accessed),
    )(xp, w1f, b1f, w2c, b2f, w3c, b3f, w4_col, b4_s)

    return out.reshape(B_pad, 1)[:B]


def init_params(key):
    """PyTorch nn.Linear default init: U(+/- 1/sqrt(fan_in)).
    Weights stored (out_features, in_features); biases stored (out_features, 1)."""
    dims = [(HID, IN_DIM), (HID, HID), (HID, HID), (1, HID)]
    params = []
    for (fan_out, fan_in) in dims:
        key, kw, kb = jax.random.split(key, 3)
        bound = 1.0 / jnp.sqrt(jnp.float32(fan_in))
        w = jax.random.uniform(kw, (fan_out, fan_in), jnp.float32,
                               minval=-bound, maxval=bound)
        b = jax.random.uniform(kb, (fan_out, 1), jnp.float32,
                               minval=-bound, maxval=bound)
        params += [w, b]
    return tuple(params)


def mlp_reference(x, params):
    w1, b1, w2, b2, w3, b3, w4, b4 = params
    h = jnp.maximum(x @ w1.T + b1[:, 0], 0.0)
    h = jnp.maximum(h @ w2.T + b2[:, 0], 0.0)
    h = jnp.maximum(h @ w3.T + b3[:, 0], 0.0)
    return h @ w4.T + b4[:, 0]


if __name__ == "__main__":
    key = jax.random.PRNGKey(0)
    key, kx = jax.random.split(key)

    B = 8  # small batch; feature dim fixed at 19 by the module
    x = jax.random.normal(kx, (B, IN_DIM), jnp.float32)
    params = init_params(key)
    ref = mlp_reference(x, params)

    # Exact f32 path (matches PyTorch f32 semantics).
    out_f32 = jax.block_until_ready(mlp_forward(x, params, use_bf16=False))
    assert out_f32.shape == (B, 1)
    assert jnp.allclose(out_f32, ref, atol=1e-4, rtol=1e-4), "f32 mismatch"

    # bf16 fast path: layer 1 / input stay f32, layers 2-3 use bf16 operands.
    out_bf16 = jax.block_until_ready(mlp_forward(x, params, use_bf16=True))
    assert jnp.allclose(out_bf16, ref, atol=5e-2, rtol=5e-2), "bf16 mismatch"

    # Ragged, multi-tile batch exercises padding, tile selection and grid > 1
    # (both TensorCores get a tile on v7x).
    key, kx2 = jax.random.split(key)
    B2 = 300
    x2 = jax.random.normal(kx2, (B2, IN_DIM), jnp.float32)
    out2 = jax.block_until_ready(mlp_forward(x2, params, use_bf16=False))
    assert out2.shape == (B2, 1)
    assert jnp.allclose(out2, mlp_reference(x2, params), atol=1e-4, rtol=1e-4), \
        "ragged-batch mismatch"

    print("KERNEL_OK")
</pallas_src>

<mosaic_0001>
module attributes {stable_mosaic.version = 11 : i64} {
  func.func @mlp_kernel(%arg0: i32, %arg1: memref<256x19xf32, #tpu.memory_space<vmem>>, %arg2: memref<256x19xf32, #tpu.memory_space<vmem>>, %arg3: memref<256x1xf32, #tpu.memory_space<vmem>>, %arg4: memref<256x256xf32, #tpu.memory_space<vmem>>, %arg5: memref<256x1xf32, #tpu.memory_space<vmem>>, %arg6: memref<256x256xf32, #tpu.memory_space<vmem>>, %arg7: memref<256x1xf32, #tpu.memory_space<vmem>>, %arg8: memref<256x1xf32, #tpu.memory_space<vmem>>, %arg9: memref<1x1xf32, #tpu.memory_space<vmem>>, %arg10: memref<1x256xf32, #tpu.memory_space<vmem>>) attributes {dimension_semantics = [#tpu.dimension_semantics<parallel>], iteration_bounds = array<i64: 1>, scalar_prefetch = 0 : i64, scratch_operands = 0 : i64, tpu.core_type = #tpu.core_type<tc>, window_params = [{transform_indices = @transform_0, window_bounds = array<i64: 256, 19>}, {pipeline_mode = #tpu.pipeline_mode<synchronous>, transform_indices = @transform_1, window_bounds = array<i64: 256, 19>}, {pipeline_mode = #tpu.pipeline_mode<synchronous>, transform_indices = @transform_2, window_bounds = array<i64: 256, 1>}, {pipeline_mode = #tpu.pipeline_mode<synchronous>, transform_indices = @transform_3, window_bounds = array<i64: 256, 256>}, {pipeline_mode = #tpu.pipeline_mode<synchronous>, transform_indices = @transform_4, window_bounds = array<i64: 256, 1>}, {pipeline_mode = #tpu.pipeline_mode<synchronous>, transform_indices = @transform_5, window_bounds = array<i64: 256, 256>}, {pipeline_mode = #tpu.pipeline_mode<synchronous>, transform_indices = @transform_6, window_bounds = array<i64: 256, 1>}, {pipeline_mode = #tpu.pipeline_mode<synchronous>, transform_indices = @transform_7, window_bounds = array<i64: 256, 1>}, {pipeline_mode = #tpu.pipeline_mode<synchronous>, transform_indices = @transform_8, window_bounds = array<i64: 1, 1>}, {transform_indices = @transform_9, window_bounds = array<i64: 1, 256>}]} {
    %c0 = arith.constant 0 : index
    %c0_0 = arith.constant 0 : index
    %0 = vector.load %arg2[%c0, %c0_0] : memref<256x19xf32, #tpu.memory_space<vmem>>, vector<256x19xf32>
    %c0_1 = arith.constant 0 : index
    %c0_2 = arith.constant 0 : index
    %1 = vector.load %arg1[%c0_1, %c0_2] : memref<256x19xf32, #tpu.memory_space<vmem>>, vector<256x19xf32>
    %cst = arith.constant dense<0.000000e+00> : vector<256x256xf32>
    %2 = tpu.matmul %0, %1, %cst {dimension_numbers = #tpu.dot_dimension_numbers<[1], [1], [0], [0], [0, 0, 1, 0], [], []>} : vector<256x19xf32>, vector<256x19xf32>, vector<256x256xf32> -> vector<256x256xf32>
    %c0_3 = arith.constant 0 : index
    %c0_4 = arith.constant 0 : index
    %3 = vector.load %arg3[%c0_3, %c0_4] : memref<256x1xf32, #tpu.memory_space<vmem>>, vector<256x1xf32>
    %4 = vector.broadcast %3 : vector<256x1xf32> to vector<256x256xf32>
    %5 = arith.addf %2, %4 : vector<256x256xf32>
    %cst_5 = arith.constant 0.000000e+00 : f32
    %6 = vector.broadcast %cst_5 : f32 to vector<256x256xf32>
    %7 = arith.maximumf %5, %6 : vector<256x256xf32>
    %c0_6 = arith.constant 0 : index
    %c0_7 = arith.constant 0 : index
    %8 = vector.load %arg4[%c0_6, %c0_7] : memref<256x256xf32, #tpu.memory_space<vmem>>, vector<256x256xf32>
    %cst_8 = arith.constant dense<0.000000e+00> : vector<256x256xf32>
    %9 = tpu.matmul %8, %7, %cst_8 {dimension_numbers = #tpu.dot_dimension_numbers<[1], [0], [0], [1], [0, 0, 1, 1], [], []>} : vector<256x256xf32>, vector<256x256xf32>, vector<256x256xf32> -> vector<256x256xf32>
    %c0_9 = arith.constant 0 : index
    %c0_10 = arith.constant 0 : index
    %10 = vector.load %arg5[%c0_9, %c0_10] : memref<256x1xf32, #tpu.memory_space<vmem>>, vector<256x1xf32>
    %11 = vector.broadcast %10 : vector<256x1xf32> to vector<256x256xf32>
    %12 = arith.addf %9, %11 : vector<256x256xf32>
    %cst_11 = arith.constant 0.000000e+00 : f32
    %13 = vector.broadcast %cst_11 : f32 to vector<256x256xf32>
    %14 = arith.maximumf %12, %13 : vector<256x256xf32>
    %c0_12 = arith.constant 0 : index
    %c0_13 = arith.constant 0 : index
    %15 = vector.load %arg6[%c0_12, %c0_13] : memref<256x256xf32, #tpu.memory_space<vmem>>, vector<256x256xf32>
    %cst_14 = arith.constant dense<0.000000e+00> : vector<256x256xf32>
    %16 = tpu.matmul %15, %14, %cst_14 {dimension_numbers = #tpu.dot_dimension_numbers<[1], [0], [0], [1], [0, 0, 1, 1], [], []>} : vector<256x256xf32>, vector<256x256xf32>, vector<256x256xf32> -> vector<256x256xf32>
    %c0_15 = arith.constant 0 : index
    %c0_16 = arith.constant 0 : index
    %17 = vector.load %arg7[%c0_15, %c0_16] : memref<256x1xf32, #tpu.memory_space<vmem>>, vector<256x1xf32>
    %18 = vector.broadcast %17 : vector<256x1xf32> to vector<256x256xf32>
    %19 = arith.addf %16, %18 : vector<256x256xf32>
    %cst_17 = arith.constant 0.000000e+00 : f32
    %20 = vector.broadcast %cst_17 : f32 to vector<256x256xf32>
    %21 = arith.maximumf %19, %20 : vector<256x256xf32>
    %c0_18 = arith.constant 0 : index
    %c0_19 = arith.constant 0 : index
    %22 = vector.load %arg8[%c0_18, %c0_19] : memref<256x1xf32, #tpu.memory_space<vmem>>, vector<256x1xf32>
    %23 = vector.broadcast %22 : vector<256x1xf32> to vector<256x256xf32>
    %24 = arith.mulf %21, %23 : vector<256x256xf32>
    %cst_20 = arith.constant dense<0.000000e+00> : vector<256xf32>
    %25 = vector.multi_reduction <add>, %24, %cst_20 [0] : vector<256x256xf32> to vector<256xf32>
    %26 = vector.shape_cast %25 : vector<256xf32> to vector<1x256xf32>
    %c0_21 = arith.constant 0 : index
    %c0_22 = arith.constant 0 : index
    %27 = vector.load %arg9[%c0_21, %c0_22] : memref<1x1xf32, #tpu.memory_space<vmem>>, vector<1x1xf32>
    %28 = vector.broadcast %27 : vector<1x1xf32> to vector<1x256xf32>
    %29 = arith.addf %26, %28 : vector<1x256xf32>
    %c0_23 = arith.constant 0 : index
    %c0_24 = arith.constant 0 : index
    %30 = vector.load %arg10[%c0_23, %c0_24] : memref<1x256xf32, #tpu.memory_space<vmem>>, vector<1x256xf32>
    tpu.vector_store %arg10[%c0_23, %c0_24], %29 {strides = array<i32>} : memref<1x256xf32, #tpu.memory_space<vmem>>, vector<1x256xf32>,
    return
  }
  func.func @transform_0(%arg0: i32) -> (i32, i32) {
    %c0_i32 = arith.constant 0 : i32
    %c0_i32_0 = arith.constant 0 : i32
    return %arg0, %c0_i32 : i32, i32
  }
  func.func @transform_1(%arg0: i32) -> (i32, i32) {
    %c0_i32 = arith.constant 0 : i32
    %c0_i32_0 = arith.constant 0 : i32
    %c0_i32_1 = arith.constant 0 : i32
    return %c0_i32, %c0_i32_0 : i32, i32
  }
  func.func @transform_2(%arg0: i32) -> (i32, i32) {
    %c0_i32 = arith.constant 0 : i32
    %c0_i32_0 = arith.constant 0 : i32
    %c0_i32_1 = arith.constant 0 : i32
    return %c0_i32, %c0_i32_0 : i32, i32
  }
  func.func @transform_3(%arg0: i32) -> (i32, i32) {
    %c0_i32 = arith.constant 0 : i32
    %c0_i32_0 = arith.constant 0 : i32
    %c0_i32_1 = arith.constant 0 : i32
    return %c0_i32, %c0_i32_0 : i32, i32
  }
  func.func @transform_4(%arg0: i32) -> (i32, i32) {
    %c0_i32 = arith.constant 0 : i32
    %c0_i32_0 = arith.constant 0 : i32
    %c0_i32_1 = arith.constant 0 : i32
    return %c0_i32, %c0_i32_0 : i32, i32
  }
  func.func @transform_5(%arg0: i32) -> (i32, i32) {
    %c0_i32 = arith.constant 0 : i32
    %c0_i32_0 = arith.constant 0 : i32
    %c0_i32_1 = arith.constant 0 : i32
    return %c0_i32, %c0_i32_0 : i32, i32
  }
  func.func @transform_6(%arg0: i32) -> (i32, i32) {
    %c0_i32 = arith.constant 0 : i32
    %c0_i32_0 = arith.constant 0 : i32
    %c0_i32_1 = arith.constant 0 : i32
    return %c0_i32, %c0_i32_0 : i32, i32
  }
  func.func @transform_7(%arg0: i32) -> (i32, i32) {
    %c0_i32 = arith.constant 0 : i32
    %c0_i32_0 = arith.constant 0 : i32
    %c0_i32_1 = arith.constant 0 : i32
    return %c0_i32, %c0_i32_0 : i32, i32
  }
  func.func @transform_8(%arg0: i32) -> (i32, i32) {
    %c0_i32 = arith.constant 0 : i32
    %c0_i32_0 = arith.constant 0 : i32
    %c0_i32_1 = arith.constant 0 : i32
    return %c0_i32, %c0_i32_0 : i32, i32
  }
  func.func @transform_9(%arg0: i32) -> (i32, i32) {
    %c0_i32 = arith.constant 0 : i32
    %c0_i32_0 = arith.constant 0 : i32
    return %c0_i32, %arg0 : i32, i32
  }
}

</mosaic_0001>

<bundles_post_ra>
// kernel: tpu_custom_call.1
= control target key start
LH: loop header
LB: loop body
LE: loop exit
PB: predicated region body
PF: predicated region fallthrough
CT: control target
= control target key end

     0   :  { %s4365_s0 = inlined_call_operand.vmem [shape: f32[256,19], index: 0, kind: input, shape index: {}]   ;;  %s4366_s1 = inlined_call_operand.vmem [shape: f32[256,19], index: 1, kind: input, shape index: {}]   ;;  %s4367_s2 = inlined_call_operand.vmem [shape: f32[256,1], index: 2, kind: input, shape index: {}]   ;;  %s4368_s3 = inlined_call_operand.vmem [shape: f32[256,256], index: 3, kind: input, shape index: {}]   ;;  %s4369_s4 = inlined_call_operand.vmem [shape: f32[256,1], index: 4, kind: input, shape index: {}]   ;;  %s4370_s5 = inlined_call_operand.vmem [shape: f32[256,256], index: 5, kind: input, shape index: {}]   ;;  %s4371_s6 = inlined_call_operand.vmem [shape: f32[256,1], index: 6, kind: input, shape index: {}]   ;;  %s4372_s7 = inlined_call_operand.vmem [shape: f32[256,1], index: 7, kind: input, shape index: {}]   ;;  %s4373_s8 = inlined_call_operand.<no memory space> [shape: f32[1,1], index: 8, kind: input, shape index: {}]   ;;  %s4374_s9 = inlined_call_operand.hbm [shape: f32[1,256], index: 9, kind: output, shape index: {}]  }
   0x1   :  { %v14_v0 = vstv %s4373_s8 }
   0x2   :  { %15 = vst [vmem:[#allocation2] sm:$0x1] %v14_v0 }
   0x3   :  { %v98_v1 = vld [vmem:[%s4365_s0 + $0xf8] sm:$0xff]  ;;  %vm291_vm0 = vcmask 154624   ;;  %v112_v3 = vld [vmem:[%s4367_s2 + $0x68] sm:$0xff]  ;;  %v2557_v4 = vmov 0   ;;  %v97_v6 = vld [vmem:[%s4365_s0 + $0xf0] sm:$0xff] }
   0x4   :  { %v114_v2 = vld [vmem:[%s4367_s2 + $0x78] sm:$0xff]  ;;  %2534 = vset.pattern.permute.xlu1 %v2557_v4  ;;  %2533 = vset.pattern.permute.xlu0 %v2557_v4  ;;  %v113_v7 = vld [vmem:[%s4367_s2 + $0x70] sm:$0xff]  ;;  %v111_v8 = vld [vmem:[%s4367_s2 + $0x60] sm:$0xff] }
   0x5   :  { %v82_v5 = vld [vmem:[%s4365_s0 + $0x78] sm:$0xff]  ;;  %2402 = vmatprep.subr.msk.mxu0 %vm291_vm0, %v98_v1  ;;  %2498 = vmatprep.subr.msk.mxu1 %vm291_vm0, %v98_v1  ;;  %v81_v9 = vld [vmem:[%s4365_s0 + $0x70] sm:$0xff]  ;;  %v96_v10 = vld [vmem:[%s4365_s0 + $0xe8] sm:$0xff] }
   0x6   :  { %208 = vperm.xlu0 %2533, %v114_v2   ;;  %198 = vperm.xlu1 %2534, %v112_v3   ;;  %v110_v11 = vld [vmem:[%s4367_s2 + $0x58] sm:$0xff]  ;;  %v109_v12 = vld [vmem:[%s4367_s2 + $0x50] sm:$0xff]  ;;  %v80_v13 = vld [vmem:[%s4365_s0 + $0x68] sm:$0xff] }
   0x7   :  { %2403 = vmatpush3.xpose.msk.msra.mxu0 %vm291_vm0, %v82_v5  ;;  %2514 = vmatpush3.xpose.msk.msra.mxu1 %vm291_vm0, %v82_v5  ;;  %v95_v14 = vld [vmem:[%s4365_s0 + $0xe0] sm:$0xff]  ;;  %v108_v15 = vld [vmem:[%s4367_s2 + $0x48] sm:$0xff]  ;;  %v94_v18 = vld [vmem:[%s4365_s0 + $0xd8] sm:$0xff] }
   0x8   :  { %2404 = vmatprep.subr.msk.mxu0 %vm291_vm0, %v97_v6  ;;  %2499 = vmatprep.subr.msk.mxu1 %vm291_vm0, %v97_v6  ;;  %v107_v16 = vld [vmem:[%s4367_s2 + $0x40] sm:$0xff]  ;;  %v106_v19 = vld [vmem:[%s4367_s2 + $0x38] sm:$0xff]  ;;  %v105_v20 = vld [vmem:[%s4367_s2 + $0x30] sm:$0xff] }
   0x9   :  { %v79_v17 = vld [vmem:[%s4365_s0 + $0x60] sm:$0xff]  ;;  %v78_v21 = vld [vmem:[%s4365_s0 + $0x58] sm:$0xff]  ;;  %v93_v22 = vld [vmem:[%s4365_s0 + $0xd0] sm:$0xff] }
   0xa   :  { %203 = vperm.xlu0 %2533, %v113_v7   ;;  %193 = vperm.xlu1 %2534, %v111_v8   ;;  %v104_v23 = vld [vmem:[%s4367_s2 + $0x28] sm:$0xff]  ;;  %v103_v24 = vld [vmem:[%s4367_s2 + $0x20] sm:$0xff]  ;;  %v77_v25 = vld [vmem:[%s4365_s0 + $0x50] sm:$0xff] }
   0xb   :  { %2405 = vmatpush3.xpose.msk.msra.mxu0 %vm291_vm0, %v81_v9  ;;  %2515 = vmatpush3.xpose.msk.msra.mxu1 %vm291_vm0, %v81_v9  ;;  %v2710_v26 = vld [vmem:[%s4366_s1] sm:$0xff]  ;;  %v92_v28 = vld [vmem:[%s4365_s0 + $0xc8] sm:$0xff]  ;;  %v102_v29 = vld [vmem:[%s4367_s2 + $0x18] sm:$0xff] }
   0xc   :  { %2406 = vmatprep.subr.msk.mxu0 %vm291_vm0, %v96_v10  ;;  %2500 = vmatprep.subr.msk.mxu1 %vm291_vm0, %v96_v10  ;;  %v2715_v27 = vld [vmem:[%s4366_s1 + $0x80] sm:$0xff]  ;;  %v101_v30 = vld [vmem:[%s4367_s2 + $0x10] sm:$0xff]  ;;  %v76_v31 = vld [vmem:[%s4365_s0 + $0x48] sm:$0xff] }
   0xd   :  { %2434 = vmatprep.mubr.msk.f32.mxu0 %vm291_vm0, %v2710_v26  ;;  %2466 = vmatprep.mubr.msk.f32.mxu1 %vm291_vm0, %v2715_v27  ;;  %v91_v32 = vld [vmem:[%s4365_s0 + $0xc0] sm:$0xff]  ;;  %v100_v33 = vld [vmem:[%s4367_s2 + $0x8] sm:$0xff]  ;;  %v90_v36 = vld [vmem:[%s4365_s0 + $0xb8] sm:$0xff] }
   0xe   :  { %188 = vperm.xlu0 %2533, %v110_v11   ;;  %183 = vperm.xlu1 %2534, %v109_v12   ;;  %v99_v34 = vld [vmem:[%s4367_s2] sm:$0xff]  ;;  %v130_v37 = vld [vmem:[%s4367_s2 + $0xf8] sm:$0xff]  ;;  %v129_v38 = vld [vmem:[%s4367_s2 + $0xf0] sm:$0xff] }
   0xf   :  { %2407 = vmatpush3.xpose.msk.msra.mxu0 %vm291_vm0, %v80_v13  ;;  %2516 = vmatpush3.xpose.msk.msra.mxu1 %vm291_vm0, %v80_v13  ;;  %v75_v35 = vld [vmem:[%s4365_s0 + $0x40] sm:$0xff]  ;;  %v74_v39 = vld [vmem:[%s4365_s0 + $0x38] sm:$0xff]  ;;  %v89_v40 = vld [vmem:[%s4365_s0 + $0xb0] sm:$0xff] }
  0x10   :  { %2408 = vmatprep.subr.msk.mxu0 %vm291_vm0, %v95_v14  ;;  %2501 = vmatprep.subr.msk.mxu1 %vm291_vm0, %v95_v14  ;;  %v128_v41 = vld [vmem:[%s4367_s2 + $0xe8] sm:$0xff]  ;;  %v127_v42 = vld [vmem:[%s4367_s2 + $0xe0] sm:$0xff]  ;;  %v73_v43 = vld [vmem:[%s4365_s0 + $0x30] sm:$0xff] }
  0x11   :  { %v88_v44 = vld [vmem:[%s4365_s0 + $0xa8] sm:$0xff]  ;;  %v126_v45 = vld [vmem:[%s4367_s2 + $0xd8] sm:$0xff]  ;;  %v125_v46 = vld [vmem:[%s4367_s2 + $0xd0] sm:$0xff] }
  0x12   :  { %178 = vperm.xlu0 %2533, %v108_v15   ;;  %173 = vperm.xlu1 %2534, %v107_v16   ;;  %v72_v47 = vld [vmem:[%s4365_s0 + $0x28] sm:$0xff]  ;;  %v87_v48 = vld [vmem:[%s4365_s0 + $0xa0] sm:$0xff]  ;;  %v86_v52 = vld [vmem:[%s4365_s0 + $0x98] sm:$0xff] }
  0x13   :  { %2409 = vmatpush3.xpose.msk.msra.mxu0 %vm291_vm0, %v79_v17  ;;  %2517 = vmatpush3.xpose.msk.msra.mxu1 %vm291_vm0, %v79_v17  ;;  %v124_v49 = vld [vmem:[%s4367_s2 + $0xc8] sm:$0xff]  ;;  %v123_v50 = vld [vmem:[%s4367_s2 + $0xc0] sm:$0xff]  ;;  %v122_v53 = vld [vmem:[%s4367_s2 + $0xb8] sm:$0xff] }
  0x14   :  { %2410 = vmatprep.subr.msk.mxu0 %vm291_vm0, %v94_v18  ;;  %2502 = vmatprep.subr.msk.mxu1 %vm291_vm0, %v94_v18  ;;  %v71_v51 = vld [vmem:[%s4365_s0 + $0x20] sm:$0xff]  ;;  %v121_v54 = vld [vmem:[%s4367_s2 + $0xb0] sm:$0xff]  ;;  %v70_v55 = vld [vmem:[%s4365_s0 + $0x18] sm:$0xff] }
  0x15   :  { %v85_v56 = vld [vmem:[%s4365_s0 + $0x90] sm:$0xff] }
  0x16   :  { %168 = vperm.xlu0 %2533, %v106_v19   ;;  %163 = vperm.xlu1 %2534, %v105_v20  }
  0x17   :  { %2411 = vmatpush3.xpose.msk.msra.mxu0 %vm291_vm0, %v78_v21  ;;  %2518 = vmatpush3.xpose.msk.msra.mxu1 %vm291_vm0, %v78_v21 }
  0x18   :  { %2412 = vmatprep.subr.msk.mxu0 %vm291_vm0, %v93_v22  ;;  %2503 = vmatprep.subr.msk.mxu1 %vm291_vm0, %v93_v22 }
  0x1a   :  { %158 = vperm.xlu0 %2533, %v104_v23   ;;  %153 = vperm.xlu1 %2534, %v103_v24  }
  0x1b   :  { %2413 = vmatpush3.xpose.msk.msra.mxu0 %vm291_vm0, %v77_v25  ;;  %2519 = vmatpush3.xpose.msk.msra.mxu1 %vm291_vm0, %v77_v25 }
  0x1c   :  { %2414 = vmatprep.subr.msk.mxu0 %vm291_vm0, %v92_v28  ;;  %2504 = vmatprep.subr.msk.mxu1 %vm291_vm0, %v92_v28 }
  0x1e   :  { %148 = vperm.xlu0 %2533, %v102_v29   ;;  %143 = vperm.xlu1 %2534, %v101_v30  }
  0x1f   :  { %2415 = vmatpush3.xpose.msk.msra.mxu0 %vm291_vm0, %v76_v31  ;;  %2520 = vmatpush3.xpose.msk.msra.mxu1 %vm291_vm0, %v76_v31 }
  0x20   :  { %2416 = vmatprep.subr.msk.mxu0 %vm291_vm0, %v91_v32  ;;  %2505 = vmatprep.subr.msk.mxu1 %vm291_vm0, %v91_v32 }
  0x22   :  { %138 = vperm.xlu0 %2533, %v100_v33   ;;  %133 = vperm.xlu1 %2534, %v99_v34  }
  0x23   :  { %2417 = vmatpush3.xpose.msk.msra.mxu0 %vm291_vm0, %v75_v35  ;;  %2521 = vmatpush3.xpose.msk.msra.mxu1 %vm291_vm0, %v75_v35 }
  0x24   :  { %2418 = vmatprep.subr.msk.mxu0 %vm291_vm0, %v90_v36  ;;  %2506 = vmatprep.subr.msk.mxu1 %vm291_vm0, %v90_v36 }
  0x26   :  { %288 = vperm.xlu0 %2533, %v130_v37   ;;  %283 = vperm.xlu1 %2534, %v129_v38  }
  0x27   :  { %2419 = vmatpush3.xpose.msk.msra.mxu0 %vm291_vm0, %v74_v39  ;;  %2522 = vmatpush3.xpose.msk.msra.mxu1 %vm291_vm0, %v74_v39 }
  0x28   :  { %2420 = vmatprep.subr.msk.mxu0 %vm291_vm0, %v89_v40  ;;  %2507 = vmatprep.subr.msk.mxu1 %vm291_vm0, %v89_v40 }
  0x2a   :  { %278 = vperm.xlu0 %2533, %v128_v41   ;;  %273 = vperm.xlu1 %2534, %v127_v42  }
  0x2b   :  { %2421 = vmatpush3.xpose.msk.msra.mxu0 %vm291_vm0, %v73_v43  ;;  %2523 = vmatpush3.xpose.msk.msra.mxu1 %vm291_vm0, %v73_v43 }
  0x2c   :  { %2422 = vmatprep.subr.msk.mxu0 %vm291_vm0, %v88_v44  ;;  %2508 = vmatprep.subr.msk.mxu1 %vm291_vm0, %v88_v44 }
  0x2e   :  { %268 = vperm.xlu0 %2533, %v126_v45   ;;  %263 = vperm.xlu1 %2534, %v125_v46  }
  0x2f   :  { %2423 = vmatpush3.xpose.msk.msra.mxu0 %vm291_vm0, %v72_v47  ;;  %2524 = vmatpush3.xpose.msk.msra.mxu1 %vm291_vm0, %v72_v47 }
  0x30   :  { %2424 = vmatprep.subr.msk.mxu0 %vm291_vm0, %v87_v48  ;;  %2509 = vmatprep.subr.msk.mxu1 %vm291_vm0, %v87_v48 }
  0x32   :  { %258 = vperm.xlu0 %2533, %v124_v49   ;;  %253 = vperm.xlu1 %2534, %v123_v50  }
  0x33   :  { %2425 = vmatpush3.xpose.msk.msra.mxu0 %vm291_vm0, %v71_v51  ;;  %2525 = vmatpush3.xpose.msk.msra.mxu1 %vm291_vm0, %v71_v51 }
  0x34   :  { %2426 = vmatprep.subr.msk.mxu0 %vm291_vm0, %v86_v52  ;;  %2510 = vmatprep.subr.msk.mxu1 %vm291_vm0, %v86_v52 }
  0x36   :  { %248 = vperm.xlu0 %2533, %v122_v53   ;;  %243 = vperm.xlu1 %2534, %v121_v54  }
  0x37   :  { %16 = vsyncpa [#allocation4], 0  ;;  %2427 = vmatpush3.xpose.msk.msra.mxu0 %vm291_vm0, %v70_v55  ;;  %2526 = vmatpush3.xpose.msk.msra.mxu1 %vm291_vm0, %v70_v55  ;;  %v120_v57 = vld [vmem:[%s4367_s2 + $0xa8] sm:$0xff]  ;;  %v119_v58 = vld [vmem:[%s4367_s2 + $0xa0] sm:$0xff] }
  0x38   :  { %2428 = vmatprep.subr.msk.mxu0 %vm291_vm0, %v85_v56  ;;  %2511 = vmatprep.subr.msk.mxu1 %vm291_vm0, %v85_v56  ;;  %v69_v59 = vld [vmem:[%s4365_s0 + $0x10] sm:$0xff]  ;;  %v84_v60 = vld [vmem:[%s4365_s0 + $0x88] sm:$0xff]  ;;  %v118_v61 = vld [vmem:[%s4367_s2 + $0x98] sm:$0xff] }
  0x39   :  { %v117_v62 = vld [vmem:[%s4367_s2 + $0x90] sm:$0xff]  ;;  %v68_v63 = vld [vmem:[%s4365_s0 + $0x8] sm:$0xff]  ;;  %v83_v0 = vld [vmem:[%s4365_s0 + $0x80] sm:$0xff] }
  0x3a   :  { %238 = vperm.xlu0 %2533, %v120_v57   ;;  %233 = vperm.xlu1 %2534, %v119_v58   ;;  %v116_v1 = vld [vmem:[%s4367_s2 + $0x88] sm:$0xff]  ;;  %v115_v2 = vld [vmem:[%s4367_s2 + $0x80] sm:$0xff]  ;;  %v884_v4 = vld [vmem:[%s4369_s4 + $0x78] sm:$0xff] }
  0x3b   :  { %2429 = vmatpush3.xpose.msk.msra.mxu0 %vm291_vm0, %v69_v59  ;;  %2527 = vmatpush3.xpose.msk.msra.mxu1 %vm291_vm0, %v69_v59  ;;  %v67_v3 = vld [vmem:[%s4365_s0] sm:$0xff]  ;;  %v883_v5 = vld [vmem:[%s4369_s4 + $0x70] sm:$0xff]  ;;  %v36_v6 = vld [vmem:[%s4366_s1 + $0x8] sm:$0xff] }
  0x3c   :  { %2430 = vmatprep.subr.msk.mxu0 %vm291_vm0, %v84_v60  ;;  %2512 = vmatprep.subr.msk.mxu1 %vm291_vm0, %v84_v60  ;;  %v52_v7 = vld [vmem:[%s4366_s1 + $0x88] sm:$0xff]  ;;  %v881_v9 = vld [vmem:[%s4369_s4 + $0x60] sm:$0xff]  ;;  %v37_v10 = vld [vmem:[%s4366_s1 + $0x10] sm:$0xff] }
  0x3d   :  { %v882_v8 = vld [vmem:[%s4369_s4 + $0x68] sm:$0xff]  ;;  %v53_v11 = vld [vmem:[%s4366_s1 + $0x90] sm:$0xff]  ;;  %v880_v12 = vld [vmem:[%s4369_s4 + $0x58] sm:$0xff] }
  0x3e   :  { %228 = vperm.xlu0 %2533, %v118_v61   ;;  %223 = vperm.xlu1 %2534, %v117_v62   ;;  %v879_v13 = vld [vmem:[%s4369_s4 + $0x50] sm:$0xff]  ;;  %v38_v14 = vld [vmem:[%s4366_s1 + $0x18] sm:$0xff]  ;;  %v878_v16 = vld [vmem:[%s4369_s4 + $0x48] sm:$0xff] }
  0x3f   :  { %2431 = vmatpush3.xpose.msk.msra.mxu0 %vm291_vm0, %v68_v63  ;;  %2528 = vmatpush3.xpose.msk.msra.mxu1 %vm291_vm0, %v68_v63  ;;  %v54_v15 = vld [vmem:[%s4366_s1 + $0x98] sm:$0xff]  ;;  %v877_v17 = vld [vmem:[%s4369_s4 + $0x40] sm:$0xff]  ;;  %v875_v21 = vld [vmem:[%s4369_s4 + $0x30] sm:$0xff] }
  0x40   :  { %2432 = vmatprep.subr.msk.mxu0 %vm291_vm0, %v83_v0  ;;  %2513 = vmatprep.subr.msk.mxu1 %vm291_vm0, %v83_v0  ;;  %v39_v18 = vld [vmem:[%s4366_s1 + $0x20] sm:$0xff]  ;;  %v876_v20 = vld [vmem:[%s4369_s4 + $0x38] sm:$0xff]  ;;  %v40_v22 = vld [vmem:[%s4366_s1 + $0x28] sm:$0xff] }
  0x41   :  { %v55_v19 = vld [vmem:[%s4366_s1 + $0xa0] sm:$0xff]  ;;  %v56_v23 = vld [vmem:[%s4366_s1 + $0xa8] sm:$0xff]  ;;  %v872_v28 = vld [vmem:[%s4369_s4 + $0x18] sm:$0xff] }
  0x42   :  { %218 = vperm.xlu0 %2533, %v116_v1   ;;  %213 = vperm.xlu1 %2534, %v115_v2   ;;  %v874_v24 = vld [vmem:[%s4369_s4 + $0x28] sm:$0xff]  ;;  %v873_v25 = vld [vmem:[%s4369_s4 + $0x20] sm:$0xff]  ;;  %v871_v29 = vld [vmem:[%s4369_s4 + $0x10] sm:$0xff] }
  0x43   :  { %2433 = vmatpush3.xpose.msk.msra.mxu0 %vm291_vm0, %v67_v3  ;;  %2529 = vmatpush3.xpose.msk.msra.mxu1 %vm291_vm0, %v67_v3  ;;  %v42_v30 = vld [vmem:[%s4366_s1 + $0x38] sm:$0xff]  ;;  %v870_v32 = vld [vmem:[%s4369_s4 + $0x8] sm:$0xff]  ;;  %v869_v33 = vld [vmem:[%s4369_s4] sm:$0xff] }
  0x44   :  { %v58_v31 = vld [vmem:[%s4366_s1 + $0xb8] sm:$0xff]  ;;  %v43_v34 = vld [vmem:[%s4366_s1 + $0x40] sm:$0xff]  ;;  %v899_v37 = vld [vmem:[%s4369_s4 + $0xf0] sm:$0xff] }
  0x45   :  { %v59_v35 = vld [vmem:[%s4366_s1 + $0xc0] sm:$0xff]  ;;  %v900_v36 = vld [vmem:[%s4369_s4 + $0xf8] sm:$0xff]  ;;  %v44_v38 = vld [vmem:[%s4366_s1 + $0x48] sm:$0xff] }
  0x46   :  { %2435 = vmatmul.mubr.msk.f32.vlgmr.msra.gmra.mxu0 %vm291_vm0, %v2710_v26  ;;  %2467 = vmatmul.mubr.msk.f32.vlgmr.msra.gmra.mxu1 %vm291_vm0, %v2715_v27  ;;  %v41_v26 = vld [vmem:[%s4366_s1 + $0x30] sm:$0xff]  ;;  %v60_v39 = vld [vmem:[%s4366_s1 + $0xc8] sm:$0xff]  ;;  %v897_v41 = vld [vmem:[%s4369_s4 + $0xe0] sm:$0xff] }
  0x47   :  { %978 = vperm.xlu0 %2533, %v884_v4   ;;  %973 = vperm.xlu1 %2534, %v883_v5   ;;  %v57_v27 = vld [vmem:[%s4366_s1 + $0xb0] sm:$0xff]  ;;  %v898_v40 = vld [vmem:[%s4369_s4 + $0xe8] sm:$0xff]  ;;  %v896_v44 = vld [vmem:[%s4369_s4 + $0xd8] sm:$0xff] }
  0x48   :  { %2436 = vmatprep.mubr.msk.f32.mxu0 %vm291_vm0, %v36_v6  ;;  %2468 = vmatprep.mubr.msk.f32.mxu1 %vm291_vm0, %v52_v7  ;;  %v45_v42 = vld [vmem:[%s4366_s1 + $0x50] sm:$0xff]  ;;  %v46_v46 = vld [vmem:[%s4366_s1 + $0x58] sm:$0xff]  ;;  %v894_v48 = vld [vmem:[%s4369_s4 + $0xc8] sm:$0xff] }
  0x49   :  { %v61_v43 = vld [vmem:[%s4366_s1 + $0xd0] sm:$0xff]  ;;  %v62_v47 = vld [vmem:[%s4366_s1 + $0xd8] sm:$0xff]  ;;  %v893_v49 = vld [vmem:[%s4369_s4 + $0xc0] sm:$0xff] }
  0x4a   :  { %2437 = vmatmul.mubr.msk.f32.gmra.mxu0 %vm291_vm0, %v36_v6  ;;  %2469 = vmatmul.mubr.msk.f32.gmra.mxu1 %vm291_vm0, %v52_v7  ;;  %v895_v45 = vld [vmem:[%s4369_s4 + $0xd0] sm:$0xff]  ;;  %v47_v50 = vld [vmem:[%s4366_s1 + $0x60] sm:$0xff]  ;;  %v892_v52 = vld [vmem:[%s4369_s4 + $0xb8] sm:$0xff] }
  0x4b   :  { %968 = vperm.xlu0 %2533, %v882_v8   ;;  %963 = vperm.xlu1 %2534, %v881_v9   ;;  %v63_v51 = vld [vmem:[%s4366_s1 + $0xe0] sm:$0xff]  ;;  %v891_v53 = vld [vmem:[%s4369_s4 + $0xb0] sm:$0xff]  ;;  %v48_v54 = vld [vmem:[%s4366_s1 + $0x68] sm:$0xff] }
  0x4c   :  { %2438 = vmatprep.mubr.msk.f32.mxu0 %vm291_vm0, %v37_v10  ;;  %2470 = vmatprep.mubr.msk.f32.mxu1 %vm291_vm0, %v53_v11  ;;  %v64_v55 = vld [vmem:[%s4366_s1 + $0xe8] sm:$0xff]  ;;  %v889_v57 = vld [vmem:[%s4369_s4 + $0xa0] sm:$0xff]  ;;  %v49_v58 = vld [vmem:[%s4366_s1 + $0x70] sm:$0xff] }
  0x4d   :  { %v890_v56 = vld [vmem:[%s4369_s4 + $0xa8] sm:$0xff]  ;;  %v65_v59 = vld [vmem:[%s4366_s1 + $0xf0] sm:$0xff]  ;;  %v888_v60 = vld [vmem:[%s4369_s4 + $0x98] sm:$0xff] }
  0x4e   :  { %2439 = vmatmul.mubr.msk.f32.gmra.mxu0 %vm291_vm0, %v37_v10  ;;  %2471 = vmatmul.mubr.msk.f32.gmra.mxu1 %vm291_vm0, %v53_v11  ;;  %v887_v61 = vld [vmem:[%s4369_s4 + $0x90] sm:$0xff]  ;;  %v50_v62 = vld [vmem:[%s4366_s1 + $0x78] sm:$0xff]  ;;  %v886_v0 = vld [vmem:[%s4369_s4 + $0x88] sm:$0xff] }
  0x4f   :  { %958 = vperm.xlu0 %2533, %v880_v12   ;;  %953 = vperm.xlu1 %2534, %v879_v13   ;;  %v66_v63 = vld [vmem:[%s4366_s1 + $0xf8] sm:$0xff]  ;;  %v885_v1 = vld [vmem:[%s4369_s4 + $0x80] sm:$0xff]  ;;  %v1447_v3 = vld [vmem:[%s4371_s6 + $0x8] sm:$0xff] }
  0x50   :  { %2440 = vmatprep.mubr.msk.f32.mxu0 %vm291_vm0, %v38_v14  ;;  %2472 = vmatprep.mubr.msk.f32.mxu1 %vm291_vm0, %v54_v15  ;;  %v1446_v2 = vld [vmem:[%s4371_s6] sm:$0xff]  ;;  %v1448_v4 = vld [vmem:[%s4371_s6 + $0x10] sm:$0xff]  ;;  %v1449_v5 = vld [vmem:[%s4371_s6 + $0x18] sm:$0xff] }
  0x51   :  { %v1450_v6 = vld [vmem:[%s4371_s6 + $0x20] sm:$0xff]  ;;  %v1451_v7 = vld [vmem:[%s4371_s6 + $0x28] sm:$0xff]  ;;  %v1452_v8 = vld [vmem:[%s4371_s6 + $0x30] sm:$0xff] }
  0x52   :  { %2441 = vmatmul.mubr.msk.f32.gmra.mxu0 %vm291_vm0, %v38_v14  ;;  %2473 = vmatmul.mubr.msk.f32.gmra.mxu1 %vm291_vm0, %v54_v15  ;;  %v1453_v9 = vld [vmem:[%s4371_s6 + $0x38] sm:$0xff]  ;;  %v1454_v10 = vld [vmem:[%s4371_s6 + $0x40] sm:$0xff]  ;;  %v1455_v11 = vld [vmem:[%s4371_s6 + $0x48] sm:$0xff] }
  0x53   :  { %948 = vperm.xlu0 %2533, %v878_v16   ;;  %943 = vperm.xlu1 %2534, %v877_v17   ;;  %v1456_v12 = vld [vmem:[%s4371_s6 + $0x50] sm:$0xff]  ;;  %v1457_v13 = vld [vmem:[%s4371_s6 + $0x58] sm:$0xff]  ;;  %v1458_v14 = vld [vmem:[%s4371_s6 + $0x60] sm:$0xff] }
  0x54   :  { %2442 = vmatprep.mubr.msk.f32.mxu0 %vm291_vm0, %v39_v18  ;;  %2474 = vmatprep.mubr.msk.f32.mxu1 %vm291_vm0, %v55_v19  ;;  %v1459_v15 = vld [vmem:[%s4371_s6 + $0x68] sm:$0xff]  ;;  %v1460_v16 = vld [vmem:[%s4371_s6 + $0x70] sm:$0xff]  ;;  %v1461_v17 = vld [vmem:[%s4371_s6 + $0x78] sm:$0xff] }
  0x56   :  { %2443 = vmatmul.mubr.msk.f32.gmra.mxu0 %vm291_vm0, %v39_v18  ;;  %2475 = vmatmul.mubr.msk.f32.gmra.mxu1 %vm291_vm0, %v55_v19  ;;  %v1462_v18 = vld [vmem:[%s4371_s6 + $0x80] sm:$0xff]  ;;  %v1463_v19 = vld [vmem:[%s4371_s6 + $0x88] sm:$0xff] }
  0x57   :  { %938 = vperm.xlu0 %2533, %v876_v20   ;;  %933 = vperm.xlu1 %2534, %v875_v21   ;;  %v1464_v20 = vld [vmem:[%s4371_s6 + $0x90] sm:$0xff]  ;;  %v1465_v21 = vld [vmem:[%s4371_s6 + $0x98] sm:$0xff] }
  0x58   :  { %2444 = vmatprep.mubr.msk.f32.mxu0 %vm291_vm0, %v40_v22  ;;  %2476 = vmatprep.mubr.msk.f32.mxu1 %vm291_vm0, %v56_v23 }
  0x5a   :  { %2445 = vmatmul.mubr.msk.f32.gmra.mxu0 %vm291_vm0, %v40_v22  ;;  %2477 = vmatmul.mubr.msk.f32.gmra.mxu1 %vm291_vm0, %v56_v23  ;;  %v1466_v23 = vld [vmem:[%s4371_s6 + $0xa0] sm:$0xff] }
  0x5b   :  { %928 = vperm.xlu0 %2533, %v874_v24   ;;  %923 = vperm.xlu1 %2534, %v873_v25   ;;  %v1467_v24 = vld [vmem:[%s4371_s6 + $0xa8] sm:$0xff] }
  0x5c   :  { %2446 = vmatprep.mubr.msk.f32.mxu0 %vm291_vm0, %v41_v26  ;;  %2478 = vmatprep.mubr.msk.f32.mxu1 %vm291_vm0, %v57_v27 }
  0x5e   :  { %2447 = vmatmul.mubr.msk.f32.gmra.mxu0 %vm291_vm0, %v41_v26  ;;  %2479 = vmatmul.mubr.msk.f32.gmra.mxu1 %vm291_vm0, %v57_v27  ;;  %v1468_v26 = vld [vmem:[%s4371_s6 + $0xb0] sm:$0xff]  ;;  %v1469_v27 = vld [vmem:[%s4371_s6 + $0xb8] sm:$0xff] }
  0x5f   :  { %918 = vperm.xlu0 %2533, %v872_v28   ;;  %913 = vperm.xlu1 %2534, %v871_v29   ;;  %v1470_v29 = vld [vmem:[%s4371_s6 + $0xc0] sm:$0xff] }
  0x60   :  { %2448 = vmatprep.mubr.msk.f32.mxu0 %vm291_vm0, %v42_v30  ;;  %2480 = vmatprep.mubr.msk.f32.mxu1 %vm291_vm0, %v58_v31 }
  0x62   :  { %2449 = vmatmul.mubr.msk.f32.gmra.mxu0 %vm291_vm0, %v42_v30  ;;  %2481 = vmatmul.mubr.msk.f32.gmra.mxu1 %vm291_vm0, %v58_v31  ;;  %v1471_v30 = vld [vmem:[%s4371_s6 + $0xc8] sm:$0xff] }
  0x63   :  { %908 = vperm.xlu0 %2533, %v870_v32   ;;  %903 = vperm.xlu1 %2534, %v869_v33   ;;  %v1472_v33 = vld [vmem:[%s4371_s6 + $0xd0] sm:$0xff] }
  0x64   :  { %2450 = vmatprep.mubr.msk.f32.mxu0 %vm291_vm0, %v43_v34  ;;  %2482 = vmatprep.mubr.msk.f32.mxu1 %vm291_vm0, %v59_v35 }
  0x66   :  { %2451 = vmatmul.mubr.msk.f32.gmra.mxu0 %vm291_vm0, %v43_v34  ;;  %2483 = vmatmul.mubr.msk.f32.gmra.mxu1 %vm291_vm0, %v59_v35  ;;  %v1473_v34 = vld [vmem:[%s4371_s6 + $0xd8] sm:$0xff] }
  0x67   :  { %1058 = vperm.xlu0 %2533, %v900_v36   ;;  %1053 = vperm.xlu1 %2534, %v899_v37   ;;  %v1959_v36 = vld [vmem:[%s4372_s7] sm:$0xff]  ;;  %v1960_v37 = vld [vmem:[%s4372_s7 + $0x8] sm:$0xff] }
  0x68   :  { %2452 = vmatprep.mubr.msk.f32.mxu0 %vm291_vm0, %v44_v38  ;;  %2484 = vmatprep.mubr.msk.f32.mxu1 %vm291_vm0, %v60_v39 }
  0x6a   :  { %2453 = vmatmul.mubr.msk.f32.gmra.mxu0 %vm291_vm0, %v44_v38  ;;  %2485 = vmatmul.mubr.msk.f32.gmra.mxu1 %vm291_vm0, %v60_v39  ;;  %v1961_v39 = vld [vmem:[%s4372_s7 + $0x10] sm:$0xff] }
  0x6b   :  { %1048 = vperm.xlu0 %2533, %v898_v40   ;;  %1043 = vperm.xlu1 %2534, %v897_v41   ;;  %v1962_v40 = vld [vmem:[%s4372_s7 + $0x18] sm:$0xff] }
  0x6c   :  { %2454 = vmatprep.mubr.msk.f32.mxu0 %vm291_vm0, %v45_v42  ;;  %2486 = vmatprep.mubr.msk.f32.mxu1 %vm291_vm0, %v61_v43 }
  0x6e   :  { %2455 = vmatmul.mubr.msk.f32.gmra.mxu0 %vm291_vm0, %v45_v42  ;;  %2487 = vmatmul.mubr.msk.f32.gmra.mxu1 %vm291_vm0, %v61_v43  ;;  %v1963_v43 = vld [vmem:[%s4372_s7 + $0x20] sm:$0xff] }
  0x6f   :  { %1038 = vperm.xlu0 %2533, %v896_v44   ;;  %1033 = vperm.xlu1 %2534, %v895_v45   ;;  %v1964_v44 = vld [vmem:[%s4372_s7 + $0x28] sm:$0xff] }
  0x70   :  { %2456 = vmatprep.mubr.msk.f32.mxu0 %vm291_vm0, %v46_v46  ;;  %2488 = vmatprep.mubr.msk.f32.mxu1 %vm291_vm0, %v62_v47 }
  0x72   :  { %2457 = vmatmul.mubr.msk.f32.gmra.mxu0 %vm291_vm0, %v46_v46  ;;  %2489 = vmatmul.mubr.msk.f32.gmra.mxu1 %vm291_vm0, %v62_v47  ;;  %v1965_v46 = vld [vmem:[%s4372_s7 + $0x30] sm:$0xff]  ;;  %v1966_v47 = vld [vmem:[%s4372_s7 + $0x38] sm:$0xff] }
  0x73   :  { %1028 = vperm.xlu0 %2533, %v894_v48   ;;  %1023 = vperm.xlu1 %2534, %v893_v49   ;;  %v1967_v49 = vld [vmem:[%s4372_s7 + $0x40] sm:$0xff] }
  0x74   :  { %2458 = vmatprep.mubr.msk.f32.mxu0 %vm291_vm0, %v47_v50  ;;  %2490 = vmatprep.mubr.msk.f32.mxu1 %vm291_vm0, %v63_v51 }
  0x76   :  { %2459 = vmatmul.mubr.msk.f32.gmra.mxu0 %vm291_vm0, %v47_v50  ;;  %2491 = vmatmul.mubr.msk.f32.gmra.mxu1 %vm291_vm0, %v63_v51  ;;  %v1968_v50 = vld [vmem:[%s4372_s7 + $0x48] sm:$0xff] }
  0x77   :  { %1018 = vperm.xlu0 %2533, %v892_v52   ;;  %1013 = vperm.xlu1 %2534, %v891_v53   ;;  %v1969_v53 = vld [vmem:[%s4372_s7 + $0x50] sm:$0xff] }
  0x78   :  { %2460 = vmatprep.mubr.msk.f32.mxu0 %vm291_vm0, %v48_v54  ;;  %2492 = vmatprep.mubr.msk.f32.mxu1 %vm291_vm0, %v64_v55 }
  0x7a   :  { %2461 = vmatmul.mubr.msk.f32.gmra.mxu0 %vm291_vm0, %v48_v54  ;;  %2493 = vmatmul.mubr.msk.f32.gmra.mxu1 %vm291_vm0, %v64_v55  ;;  %v1970_v54 = vld [vmem:[%s4372_s7 + $0x58] sm:$0xff] }
  0x7b   :  { %1008 = vperm.xlu0 %2533, %v890_v56   ;;  %1003 = vperm.xlu1 %2534, %v889_v57   ;;  %v1971_v56 = vld [vmem:[%s4372_s7 + $0x60] sm:$0xff]  ;;  %v1972_v57 = vld [vmem:[%s4372_s7 + $0x68] sm:$0xff] }
  0x7c   :  { %2462 = vmatprep.mubr.msk.f32.mxu0 %vm291_vm0, %v49_v58  ;;  %2494 = vmatprep.mubr.msk.f32.mxu1 %vm291_vm0, %v65_v59 }
  0x7e   :  { %2463 = vmatmul.mubr.msk.f32.gmra.mxu0 %vm291_vm0, %v49_v58  ;;  %2495 = vmatmul.mubr.msk.f32.gmra.mxu1 %vm291_vm0, %v65_v59  ;;  %v1973_v59 = vld [vmem:[%s4372_s7 + $0x70] sm:$0xff] }
  0x7f   :  { %998 = vperm.xlu0 %2533, %v888_v60   ;;  %993 = vperm.xlu1 %2534, %v887_v61   ;;  %v1974_v60 = vld [vmem:[%s4372_s7 + $0x78] sm:$0xff] }
  0x80   :  { %2464 = vmatprep.mubr.msk.f32.mxu0 %vm291_vm0, %v50_v62  ;;  %2496 = vmatprep.mubr.msk.f32.mxu1 %vm291_vm0, %v66_v63 }
  0x81   :  { %v3193_v22 = vpop.permute.xlu0 %208  ;;  %v3201_v25 = vpop.permute.xlu1 %198 }
  0x82   :  { %2465 = vmatmul.mubr.msk.f32.gmra.mxu0 %vm291_vm0, %v50_v62  ;;  %2497 = vmatmul.mubr.msk.f32.gmra.mxu1 %vm291_vm0, %v66_v63  ;;  %v1975_v63 = vld [vmem:[%s4372_s7 + $0x80] sm:$0xff] }
  0x83   :  { %988 = vperm.xlu0 %2533, %v886_v0   ;;  %983 = vperm.xlu1 %2534, %v885_v1   ;;  %v1976_v0 = vld [vmem:[%s4372_s7 + $0x88] sm:$0xff] }
  0x85   :  { %v3209_v28 = vpop.permute.xlu0 %203  ;;  %v3217_v31 = vpop.permute.xlu1 %193 }
  0x87   :  { %1480 = vperm.xlu0 %2533, %v1446_v2   ;;  %1485 = vperm.xlu1 %2534, %v1447_v3   ;;  %v1977_v2 = vld [vmem:[%s4372_s7 + $0x90] sm:$0xff]  ;;  %v1978_v3 = vld [vmem:[%s4372_s7 + $0x98] sm:$0xff] }
  0x89   :  { %v3219_v32 = vpop.permute.xlu0 %188  ;;  %v3227_v35 = vpop.permute.xlu1 %183 }
  0x8b   :  { %1490 = vperm.xlu0 %2533, %v1448_v4   ;;  %1495 = vperm.xlu1 %2534, %v1449_v5   ;;  %v1979_v5 = vld [vmem:[%s4372_s7 + $0xa0] sm:$0xff] }
  0x8d   :  { %v3235_v38 = vpop.permute.xlu0 %178  ;;  %v3243_v41 = vpop.permute.xlu1 %173 }
  0x8f   :  { %1500 = vperm.xlu0 %2533, %v1450_v6   ;;  %1505 = vperm.xlu1 %2534, %v1451_v7   ;;  %v1980_v6 = vld [vmem:[%s4372_s7 + $0xa8] sm:$0xff] }
  0x91   :  { %v3245_v42 = vpop.permute.xlu0 %168  ;;  %v3253_v45 = vpop.permute.xlu1 %163 }
  0x93   :  { %1510 = vperm.xlu0 %2533, %v1452_v8   ;;  %1515 = vperm.xlu1 %2534, %v1453_v9   ;;  %v1981_v9 = vld [vmem:[%s4372_s7 + $0xb0] sm:$0xff] }
  0x95   :  { %v3261_v48 = vpop.permute.xlu0 %158  ;;  %v3269_v51 = vpop.permute.xlu1 %153 }
  0x97   :  { %1520 = vperm.xlu0 %2533, %v1454_v10   ;;  %1525 = vperm.xlu1 %2534, %v1455_v11   ;;  %v1982_v10 = vld [vmem:[%s4372_s7 + $0xb8] sm:$0xff] }
  0x99   :  { %v3271_v52 = vpop.permute.xlu0 %148  ;;  %v3279_v55 = vpop.permute.xlu1 %143 }
  0x9b   :  { %1530 = vperm.xlu0 %2533, %v1456_v12   ;;  %1535 = vperm.xlu1 %2534, %v1457_v13   ;;  %v1983_v12 = vld [vmem:[%s4372_s7 + $0xc0] sm:$0xff]  ;;  %v1984_v13 = vld [vmem:[%s4372_s7 + $0xc8] sm:$0xff] }
  0x9d   :  { %v3287_v58 = vpop.permute.xlu0 %138  ;;  %v3295_v61 = vpop.permute.xlu1 %133 }
  0x9f   :  { %1540 = vperm.xlu0 %2533, %v1458_v14   ;;  %1545 = vperm.xlu1 %2534, %v1459_v15   ;;  %v1474_v15 = vld [vmem:[%s4371_s6 + $0xe0] sm:$0xff] }
  0xa1   :  { %v3297_v62 = vpop.permute.xlu0 %288  ;;  %v3305_v1 = vpop.permute.xlu1 %283 }
  0xa3   :  { %1550 = vperm.xlu0 %2533, %v1460_v16   ;;  %1555 = vperm.xlu1 %2534, %v1461_v17   ;;  %v1985_v16 = vld [vmem:[%s4372_s7 + $0xd0] sm:$0xff] }
  0xa5   :  { %v3313_v4 = vpop.permute.xlu0 %278  ;;  %v3321_v7 = vpop.permute.xlu1 %273 }
  0xa7   :  { %1560 = vperm.xlu0 %2533, %v1462_v18   ;;  %1565 = vperm.xlu1 %2534, %v1463_v19   ;;  %v1475_v19 = vld [vmem:[%s4371_s6 + $0xe8] sm:$0xff] }
  0xa9   :  { %v3323_v8 = vpop.permute.xlu0 %268  ;;  %v3331_v11 = vpop.permute.xlu1 %263 }
  0xaa   :  { %4402 = vst [vmem:[#allocation6_spill] sm:$0xff] %v3323_v8  ;;  %4403 = vst [vmem:[#allocation7_spill] sm:$0xff] %v3331_v11 }
  0xab   :  { %1570 = vperm.xlu0 %2533, %v1464_v20   ;;  %1575 = vperm.xlu1 %2534, %v1465_v21   ;;  %v1986_v20 = vld [vmem:[%s4372_s7 + $0xd8] sm:$0xff] }
  0xad   :  { %v3339_v14 = vpop.permute.xlu0 %258  ;;  %v3347_v17 = vpop.permute.xlu1 %253 }
  0xae   :  { %4404 = vst [vmem:[#allocation8_spill] sm:$0xff] %v3339_v14  ;;  %4405 = vst [vmem:[#allocation9_spill] sm:$0xff] %v3347_v17 }
  0xaf   :  { %1580 = vperm.xlu0 %2533, %v1466_v23   ;;  %1585 = vperm.xlu1 %2534, %v1467_v24   ;;  %v1476_v23 = vld [vmem:[%s4371_s6 + $0xf0] sm:$0xff]  ;;  %v1987_v24 = vld [vmem:[%s4372_s7 + $0xe0] sm:$0xff] }
  0xb1   :  { %v3349_v18 = vpop.permute.xlu0 %248  ;;  %v3357_v21 = vpop.permute.xlu1 %243 }
  0xb2   :  { %4406 = vst [vmem:[#allocation10_spill] sm:$0xff] %v3349_v18  ;;  %4407 = vst [vmem:[#allocation11_spill] sm:$0xff] %v3357_v21 }
  0xb3   :  { %1590 = vperm.xlu0 %2533, %v1468_v26   ;;  %1595 = vperm.xlu1 %2534, %v1469_v27   ;;  %v1477_v27 = vld [vmem:[%s4371_s6 + $0xf8] sm:$0xff] }
  0xb5   :  { %v3365_v26 = vpop.permute.xlu0 %238 }
  0xb6   :  { %4408 = vst [vmem:[#allocation12_spill] sm:$0xff] %v3365_v26 }
  0xb7   :  { %1600 = vperm.xlu0 %2533, %v1470_v29   ;;  %1605 = vperm.xlu1 %2534, %v1471_v30   ;;  %v1988_v29 = vld [vmem:[%s4372_s7 + $0xe8] sm:$0xff]  ;;  %v3373_v30 = vpop.permute.xlu1 %233 }
  0xb8   :  { %4409 = vst [vmem:[#allocation13_spill] sm:$0xff] %v3373_v30 }
  0xbb   :  { %1610 = vperm.xlu0 %2533, %v1472_v33   ;;  %1615 = vperm.xlu1 %2534, %v1473_v34   ;;  %v3375_v33 = vpop.permute.xlu0 %228  ;;  %v1989_v34 = vld [vmem:[%s4372_s7 + $0xf0] sm:$0xff] }
  0xbc   :  { %4410 = vst [vmem:[#allocation14_spill] sm:$0xff] %v3375_v33 }
  0xbf   :  { %1993 = vperm.xlu0 %2533, %v1959_v36   ;;  %1998 = vperm.xlu1 %2534, %v1960_v37   ;;  %v1990_v36 = vld [vmem:[%s4372_s7 + $0xf8] sm:$0xff]  ;;  %v3383_v37 = vpop.permute.xlu1 %223 }
  0xc0   :  { %4411 = vst [vmem:[#allocation15_spill] sm:$0xff] %v3383_v37 }
  0xc3   :  { %2003 = vperm.xlu0 %2533, %v1961_v39   ;;  %2008 = vperm.xlu1 %2534, %v1962_v40   ;;  %v2289_v39 = vld [vmem:[#allocation2] sm:$0x1]  ;;  %v3385_v40 = vpop.permute.xlu0 %218 }
  0xc4   :  { %4412 = vst [vmem:[#allocation16_spill] sm:$0xff] %v3385_v40 }
  0xc7   :  { %2013 = vperm.xlu0 %2533, %v1963_v43   ;;  %2018 = vperm.xlu1 %2534, %v1964_v44  }
  0xcb   :  { %2023 = vperm.xlu0 %2533, %v1965_v46   ;;  %2028 = vperm.xlu1 %2534, %v1966_v47   ;;  %v806_v46 = vld [vmem:[%s4368_s3 + $0x8] sm:$0xff] }
  0xcc   :  { %1125 = vmatprep.mubr.f32.mxu1 %v806_v46 }
  0xcf   :  { %2033 = vperm.xlu0 %2533, %v1967_v49   ;;  %2038 = vperm.xlu1 %2534, %v1968_v50  }
  0xd3   :  { %2043 = vperm.xlu0 %2533, %v1969_v53   ;;  %2048 = vperm.xlu1 %2534, %v1970_v54  }
  0xd7   :  { %2053 = vperm.xlu0 %2533, %v1971_v56   ;;  %2058 = vperm.xlu1 %2534, %v1972_v57  }
  0xdb   :  { %2063 = vperm.xlu0 %2533, %v1973_v59   ;;  %2068 = vperm.xlu1 %2534, %v1974_v60  }
  0xdf   :  { %2073 = vperm.xlu0 %2533, %v1975_v63   ;;  %2078 = vperm.xlu1 %2534, %v1976_v0  }
  0xe3   :  { %2083 = vperm.xlu0 %2533, %v1977_v2   ;;  %2088 = vperm.xlu1 %2534, %v1978_v3  }
  0xe7   :  { %2093 = vperm.xlu0 %2533, %v1979_v5   ;;  %2098 = vperm.xlu1 %2534, %v1980_v6  }
  0xeb   :  { %2103 = vperm.xlu0 %2533, %v1981_v9   ;;  %2108 = vperm.xlu1 %2534, %v1982_v10  }
  0xef   :  { %2113 = vperm.xlu0 %2533, %v1983_v12   ;;  %2118 = vperm.xlu1 %2534, %v1984_v13  }
  0xf3   :  { %1620 = vperm.xlu0 %2533, %v1474_v15   ;;  %2123 = vperm.xlu1 %2534, %v1985_v16  }
  0xf7   :  { %1625 = vperm.xlu0 %2533, %v1475_v19   ;;  %2128 = vperm.xlu1 %2534, %v1986_v20  }
  0xfb   :  { %1630 = vperm.xlu0 %2533, %v1476_v23   ;;  %2133 = vperm.xlu1 %2534, %v1987_v24  }
  0xff   :  { %1635 = vperm.xlu0 %2533, %v1477_v27   ;;  %2138 = vperm.xlu1 %2534, %v1988_v29  }
 0x103   :  { %2143 = vperm.xlu0 %2533, %v1989_v34   ;;  %2148 = vperm.xlu1 %2534, %v1990_v36  }
 0x106   :  { %v3387_v43 = vpop.f32.mrf.mxu0  ;;  %v3389_v44 = vpop.f32.mrf.mxu1 }
 0x107   :  { %4413 = vst [vmem:[#allocation17_spill] sm:$0xff] %v3389_v44  ;;  %2292 = vperm.xlu0 %2533, %v2289_v39  }
 0x108   :  { %v3394_v47 = vpop.f32.mrf.mxu0  ;;  %v3396_v49 = vpop.f32.mrf.mxu1 }
 0x109   :  { %4414 = vst [vmem:[#allocation18_spill] sm:$0xff] %v3396_v49 }
 0x10a   :  { %v3398_v50 = vpop.f32.mrf.mxu0  ;;  %v3400_v53 = vpop.f32.mrf.mxu1 }
 0x10b   :  { %4415 = vst [vmem:[#allocation19_spill] sm:$0xff] %v3400_v53 }
 0x10c   :  { %v3402_v54 = vpop.f32.mrf.mxu0  ;;  %v3404_v56 = vpop.f32.mrf.mxu1 }
 0x10d   :  { %4416 = vst [vmem:[#allocation20_spill] sm:$0xff] %v3404_v56 }
 0x10e   :  { %v3406_v57 = vpop.f32.mrf.mxu0  ;;  %v3408_v59 = vpop.f32.mrf.mxu1 }
 0x10f   :  { %4417 = vst [vmem:[#allocation21_spill] sm:$0xff] %v3408_v59 }
 0x110   :  { %v3410_v60 = vpop.f32.mrf.mxu0  ;;  %v3412_v63 = vpop.f32.mrf.mxu1 }
 0x111   :  { %4418 = vst [vmem:[#allocation22_spill] sm:$0xff] %v3412_v63 }
 0x112   :  { %v3414_v0 = vpop.f32.mrf.mxu0  ;;  %v3416_v2 = vpop.f32.mrf.mxu1 }
 0x113   :  { %4419 = vst [vmem:[#allocation23_spill] sm:$0xff] %v3416_v2 }
 0x114   :  { %v3418_v3 = vpop.f32.mrf.mxu0  ;;  %v3420_v5 = vpop.f32.mrf.mxu1 }
 0x115   :  { %4420 = vst [vmem:[#allocation24_spill] sm:$0xff] %v3420_v5 }
 0x116   :  { %v3422_v6 = vpop.f32.mrf.mxu0  ;;  %v3424_v9 = vpop.f32.mrf.mxu1 }
 0x117   :  { %4421 = vst [vmem:[#allocation25_spill] sm:$0xff] %v3424_v9 }
 0x118   :  { %v3426_v10 = vpop.f32.mrf.mxu0  ;;  %v3428_v12 = vpop.f32.mrf.mxu1 }
 0x119   :  { %4422 = vst [vmem:[#allocation26_spill] sm:$0xff] %v3428_v12 }
 0x11a   :  { %v3430_v13 = vpop.f32.mrf.mxu0  ;;  %v3432_v15 = vpop.f32.mrf.mxu1 }
 0x11b   :  { %4423 = vst [vmem:[#allocation27_spill] sm:$0xff] %v3432_v15 }
 0x11c   :  { %v3434_v16 = vpop.f32.mrf.mxu0  ;;  %v3436_v19 = vpop.f32.mrf.mxu1 }
 0x11d   :  { %4424 = vst [vmem:[#allocation28_spill] sm:$0xff] %v3436_v19 }
 0x11e   :  { %v3438_v20 = vpop.f32.mrf.mxu0  ;;  %v3440_v23 = vpop.f32.mrf.mxu1 }
 0x11f   :  { %4425 = vst [vmem:[#allocation29_spill] sm:$0xff] %v3440_v23 }
 0x120   :  { %v3442_v24 = vpop.f32.mrf.mxu0  ;;  %v3444_v27 = vpop.f32.mrf.mxu1 }
 0x121   :  { %4426 = vst [vmem:[#allocation30_spill] sm:$0xff] %v3444_v27 }
 0x122   :  { %v3446_v29 = vpop.f32.mrf.mxu0  ;;  %v3448_v34 = vpop.f32.mrf.mxu1 }
 0x123   :  { %4427 = vst [vmem:[#allocation31_spill] sm:$0xff] %v3448_v34 }
 0x124   :  { %v3450_v36 = vpop.f32.mrf.mxu0  ;;  %v3452_v39 = vpop.f32.mrf.mxu1 }
 0x125   :  { %4428 = vst [vmem:[#allocation32_spill] sm:$0xff] %v3452_v39 }
 0x126   :  { %v3454_v46 = vpop.f32.mrf.mxu0  ;;  %v3456_v44 = vpop.f32.mrf.mxu1 }
 0x127   :  { %4429 = vst [vmem:[#allocation33_spill] sm:$0xff] %v3456_v44 }
 0x128   :  { %v600_v49 = vpop.f32.mrf.mxu0  ;;  %v3458_v53 = vpop.f32.mrf.mxu1 }
 0x129   :  { %4430 = vst [vmem:[#allocation34_spill] sm:$0xff] %v3458_v53 }
 0x12a   :  { %v604_v56 = vpop.f32.mrf.mxu0  ;;  %v3460_v40 = vpop.f32.mrf.mxu1 }
 0x12b   :  { %4431 = vst [vmem:[#allocation35_spill] sm:$0xff] %v3460_v40 }
 0x12c   :  { %v606_v59 = vpop.f32.mrf.mxu0  ;;  %v3462_v37 = vpop.f32.mrf.mxu1 }
 0x12d   :  { %4432 = vst [vmem:[#allocation36_spill] sm:$0xff] %v3462_v37 }
 0x12e   :  { %v610_v63 = vpop.f32.mrf.mxu0  ;;  %v3464_v33 = vpop.f32.mrf.mxu1 }
 0x12f   :  { %4433 = vst [vmem:[#allocation37_spill] sm:$0xff] %v3464_v33 }
 0x130   :  { %v612_v2 = vpop.f32.mrf.mxu0  ;;  %v3466_v30 = vpop.f32.mrf.mxu1 }
 0x131   :  { %4434 = vst [vmem:[#allocation38_spill] sm:$0xff] %v3466_v30 }
 0x132   :  { %v616_v5 = vpop.f32.mrf.mxu0  ;;  %v3468_v26 = vpop.f32.mrf.mxu1 }
 0x133   :  { %4435 = vst [vmem:[#allocation39_spill] sm:$0xff] %v3468_v26 }
 0x134   :  { %v618_v9 = vpop.f32.mrf.mxu0  ;;  %v3470_v21 = vpop.f32.mrf.mxu1 }
 0x135   :  { %4436 = vst [vmem:[#allocation40_spill] sm:$0xff] %v3470_v21 }
 0x136   :  { %v622_v12 = vpop.f32.mrf.mxu0  ;;  %v3472_v18 = vpop.f32.mrf.mxu1 }
 0x137   :  { %4437 = vst [vmem:[#allocation41_spill] sm:$0xff] %v3472_v18 }
 0x138   :  { %v624_v15 = vpop.f32.mrf.mxu0  ;;  %v3479_v30 = vpop.f32.mrf.mxu1 }
 0x139   :  { %v625_v21 = vadd.f32 %v624_v15, %v3217_v31 }
 0x13a   :  { %v628_v19 = vpop.f32.mrf.mxu0 }
 0x13b   :  { %v629_v11 = vadd.f32 %v628_v19, %v3201_v25 }
 0x13c   :  { %v630_v23 = vpop.f32.mrf.mxu0 }
 0x13d   :  { %v631_v14 = vadd.f32 %v630_v23, %v3201_v25  ;;  %v3486_v23 = vpop.f32.mrf.mxu1  ;;  %v613_v25 = vadd.f32 %v612_v2, %v3227_v35 }
 0x13e   :  { %v634_v27 = vpop.f32.mrf.mxu0 }
 0x13f   :  { %v635_v37 = vadd.f32 %v634_v27, %v3209_v28 }
 0x140   :  { %v636_v34 = vpop.f32.mrf.mxu0 }
 0x141   :  { %v637_v17 = vadd.f32 %v636_v34, %v3209_v28  ;;  %v769_v18 = vmax.f32 %v635_v37, 0.0  ;;  %v617_v28 = vadd.f32 %v616_v5, %v3219_v32  ;;  %v595_v37 = vadd.f32 %v3450_v36, %v3245_v42 }
 0x142   :  { %v640_v39 = vpop.f32.mrf.mxu0 }
 0x143   :  { %v641_v44 = vadd.f32 %v640_v39, %v3193_v22  ;;  %v770_v8 = vmax.f32 %v637_v17, 0.0  ;;  %v623_v39 = vadd.f32 %v622_v12, %v3217_v31  ;;  %v611_v17 = vadd.f32 %v610_v63, %v3227_v35 }
 0x144   :  { %v642_v53 = vpop.f32.mrf.mxu0  ;;  %v607_v31 = vadd.f32 %v606_v59, %v3235_v38  ;;  %v756_v12 = vmax.f32 %v595_v37, 0.0 }
 0x145   :  { %v643_v40 = vadd.f32 %v642_v53, %v3193_v22  ;;  %v771_v26 = vmax.f32 %v641_v44, 0.0  ;;  %v619_v22 = vadd.f32 %v618_v9, %v3219_v32  ;;  %v768_v53 = vmax.f32 %v631_v14, 0.0  ;;  %v3492_v32 = vpop.f32.mrf.mxu1 }
 0x146   :  { %v766_v44 = vmax.f32 %v625_v21, 0.0  ;;  %v763_v14 = vmax.f32 %v617_v28, 0.0  ;;  %v599_v21 = vadd.f32 %v3454_v46, %v3243_v41  ;;  %v761_v35 = vmax.f32 %v611_v17, 0.0 }
 0x147   :  { %v772_v33 = vmax.f32 %v643_v40, 0.0  ;;  %v767_v40 = vmax.f32 %v629_v11, 0.0  ;;  %v601_v11 = vadd.f32 %v600_v49, %v3243_v41  ;;  %v760_v59 = vmax.f32 %v607_v31, 0.0  ;;  %v730_v63 = vpop.f32.mrf.mxu1  ;;  %v4438_v31 = vld [vmem:[#allocation41_spill] sm:$0xff] }
 0x148   :  { %v589_v49 = vadd.f32 %v3442_v24, %v3253_v45  ;;  %v587_v41 = vadd.f32 %v3438_v20, %v3253_v45  ;;  %v757_v5 = vmax.f32 %v599_v21, 0.0  ;;  %v583_v9 = vadd.f32 %v3434_v16, %v3261_v48  ;;  %v4442_v21 = vld [vmem:[#allocation7_spill] sm:$0xff] }
 0x149   :  { %1061 = vmatprep.subr.mxu1 %v772_v33  ;;  %v765_v33 = vmax.f32 %v623_v39, 0.0  ;;  %v758_v2 = vmax.f32 %v601_v11, 0.0  ;;  %v732_v19 = vpop.f32.mrf.mxu1  ;;  %v577_v24 = vadd.f32 %v3426_v10, %v3269_v51  ;;  %v575_v45 = vadd.f32 %v3422_v6, %v3269_v51 }
 0x14a   :  { %1062 = vmatpush1.msra.mxu1 %v771_v26  ;;  %v764_v26 = vmax.f32 %v619_v22, 0.0  ;;  %v754_v27 = vmax.f32 %v589_v49, 0.0  ;;  %v753_v20 = vmax.f32 %v587_v41, 0.0  ;;  %v571_v16 = vadd.f32 %v3418_v3, %v3271_v52  ;;  %v4447_v41 = vld [vmem:[#allocation35_spill] sm:$0xff] }
 0x14b   :  { %1063 = vmatprep.subr.mxu1 %v770_v8  ;;  %v605_v8 = vadd.f32 %v604_v56, %v3235_v38  ;;  %v593_v38 = vadd.f32 %v3446_v29, %v3245_v42  ;;  %v581_v42 = vadd.f32 %v3430_v13, %v3261_v48  ;;  %v752_v29 = vmax.f32 %v583_v9, 0.0  ;;  %v736_v34 = vpop.f32.mrf.mxu1 }
 0x14c   :  { %1064 = vmatpush1.msra.mxu1 %v769_v18  ;;  %v762_v18 = vmax.f32 %v613_v25, 0.0  ;;  %v569_v48 = vadd.f32 %v3414_v0, %v3271_v52  ;;  %v565_v10 = vadd.f32 %v3410_v60, %v3279_v55  ;;  %v750_v36 = vmax.f32 %v577_v24, 0.0  ;;  %v4450_v24 = vld [vmem:[#allocation33_spill] sm:$0xff] }
 0x14d   :  { %1065 = vmatprep.subr.mxu1 %v768_v53  ;;  %v759_v56 = vmax.f32 %v605_v8, 0.0  ;;  %v755_v15 = vmax.f32 %v593_v38, 0.0  ;;  %v751_v13 = vmax.f32 %v581_v42, 0.0  ;;  %v563_v51 = vadd.f32 %v3406_v57, %v3279_v55  ;;  %v738_v39 = vpop.f32.mrf.mxu1  ;;  %v4439_v8 = vld [vmem:[#allocation6_spill] sm:$0xff] }
 0x14e   :  { %1066 = vmatpush1.msra.mxu1 %v767_v40  ;;  %v749_v6 = vmax.f32 %v575_v45, 0.0  ;;  %v559_v3 = vadd.f32 %v3402_v54, %v3287_v58  ;;  %v748_v46 = vmax.f32 %v571_v16, 0.0  ;;  %v557_v52 = vadd.f32 %v3398_v50, %v3287_v58  ;;  %v4449_v42 = vld [vmem:[#allocation34_spill] sm:$0xff]  ;;  %v4452_v16 = vld [vmem:[#allocation32_spill] sm:$0xff] }
 0x14f   :  { %1067 = vmatprep.subr.mxu1 %v766_v44  ;;  %v747_v0 = vmax.f32 %v569_v48, 0.0  ;;  %v553_v60 = vadd.f32 %v3394_v47, %v3295_v61  ;;  %v746_v22 = vmax.f32 %v565_v10, 0.0  ;;  %v551_v55 = vadd.f32 %v3387_v43, %v3295_v61 }
 0x150   :  { %1068 = vmatpush1.msra.mxu1 %v765_v33  ;;  %v745_v57 = vmax.f32 %v563_v51, 0.0  ;;  %v744_v53 = vmax.f32 %v559_v3, 0.0  ;;  %v739_v54 = vadd.f32 %v738_v39, %v3297_v62  ;;  %v743_v28 = vmax.f32 %v557_v52, 0.0  ;;  %v4455_v51 = vld [vmem:[#allocation30_spill] sm:$0xff]  ;;  %v4457_v39 = vld [vmem:[#allocation12_spill] sm:$0xff] }
 0x151   :  { %1069 = vmatprep.subr.mxu1 %v764_v26  ;;  %v737_v58 = vadd.f32 %v736_v34, %v3297_v62  ;;  %v742_v50 = vmax.f32 %v553_v60, 0.0  ;;  %v733_v40 = vadd.f32 %v732_v19, %v3305_v1  ;;  %v741_v47 = vmax.f32 %v551_v55, 0.0  ;;  %v4458_v60 = vld [vmem:[#allocation28_spill] sm:$0xff] }
 0x152   :  { %1070 = vmatpush1.msra.mxu1 %v763_v14  ;;  %v731_v25 = vadd.f32 %v730_v63, %v3305_v1  ;;  %v727_v61 = vadd.f32 %v3492_v32, %v3313_v4  ;;  %v804_v43 = vmax.f32 %v739_v54, 0.0  ;;  %v725_v44 = vadd.f32 %v3486_v23, %v3313_v4  ;;  %v4440_v14 = vld [vmem:[#allocation40_spill] sm:$0xff] }
 0x153   :  { %1071 = vmatprep.subr.mxu1 %v762_v18  ;;  %v803_v17 = vmax.f32 %v737_v58, 0.0  ;;  %v721_v62 = vadd.f32 %v3479_v30, %v3321_v7  ;;  %v802_v33 = vmax.f32 %v733_v40, 0.0  ;;  %v719_v26 = vadd.f32 %v4438_v31, %v3321_v7  ;;  %v4441_v18 = vld [vmem:[#allocation39_spill] sm:$0xff]  ;;  %v4446_v63 = vld [vmem:[#allocation36_spill] sm:$0xff]  ;;  %v4461_v58 = vld [vmem:[#allocation26_spill] sm:$0xff] }
 0x154   :  { %1072 = vmatpush1.msra.mxu1 %v761_v35  ;;  %v801_v1 = vmax.f32 %v731_v25, 0.0  ;;  %v715_v32 = vadd.f32 %v4440_v14, %v4439_v8  ;;  %v800_v11 = vmax.f32 %v727_v61, 0.0  ;;  %v713_v4 = vadd.f32 %v4441_v18, %v4439_v8  ;;  %v4443_v35 = vld [vmem:[#allocation38_spill] sm:$0xff] }
 0x155   :  { %1073 = vmatprep.subr.mxu1 %v760_v59  ;;  %v799_v23 = vmax.f32 %v725_v44, 0.0  ;;  %v709_v30 = vadd.f32 %v4443_v35, %v4442_v21  ;;  %v798_v37 = vmax.f32 %v721_v62, 0.0  ;;  %v4444_v59 = vld [vmem:[#allocation37_spill] sm:$0xff]  ;;  %v797_v38 = vmax.f32 %v719_v26, 0.0  ;;  %v4464_v44 = vld [vmem:[#allocation24_spill] sm:$0xff]  ;;  %v4467_v8 = vld [vmem:[#allocation22_spill] sm:$0xff] }
 0x156   :  { %1074 = vmatpush1.msra.mxu1 %v759_v56  ;;  %v707_v7 = vadd.f32 %v4444_v59, %v4442_v21  ;;  %v4445_v56 = vld [vmem:[#allocation8_spill] sm:$0xff]  ;;  %v795_v9 = vmax.f32 %v713_v4, 0.0  ;;  %v4471_v59 = vld [vmem:[#allocation19_spill] sm:$0xff] }
 0x157   :  { %1075 = vmatprep.subr.mxu1 %v758_v2  ;;  %v703_v49 = vadd.f32 %v4446_v63, %v4445_v56  ;;  %v796_v2 = vmax.f32 %v715_v32, 0.0  ;;  %v794_v19 = vmax.f32 %v709_v30, 0.0  ;;  %v4470_v21 = vld [vmem:[#allocation20_spill] sm:$0xff] }
 0x158   :  { %1076 = vmatpush1.msra.mxu1 %v757_v5  ;;  %v701_v5 = vadd.f32 %v4447_v41, %v4445_v56  ;;  %v793_v45 = vmax.f32 %v707_v7, 0.0  ;;  %v4472_v56 = vld [vmem:[#allocation18_spill] sm:$0xff] }
 0x159   :  { %1077 = vmatprep.subr.mxu1 %v756_v12  ;;  %v4448_v12 = vld [vmem:[#allocation9_spill] sm:$0xff]  ;;  %v792_v48 = vmax.f32 %v703_v49, 0.0 }
 0x15a   :  { %1078 = vmatpush1.msra.mxu1 %v755_v15  ;;  %v697_v15 = vadd.f32 %v4449_v42, %v4448_v12  ;;  %v791_v10 = vmax.f32 %v701_v5, 0.0 }
 0x15b   :  { %1079 = vmatprep.subr.mxu1 %v754_v27  ;;  %v695_v27 = vadd.f32 %v4450_v24, %v4448_v12  ;;  %v808_v24 = vld [vmem:[%s4368_s3 + $0x18] sm:$0xff] }
 0x15c   :  { %1080 = vmatpush1.msra.mxu1 %v753_v20  ;;  %v4451_v20 = vld [vmem:[#allocation10_spill] sm:$0xff]  ;;  %v790_v3 = vmax.f32 %v697_v15, 0.0 }
 0x15d   :  { %1081 = vmatprep.subr.mxu1 %v752_v29  ;;  %v691_v29 = vadd.f32 %v4452_v16, %v4451_v20  ;;  %v812_v16 = vld [vmem:[%s4368_s3 + $0x38] sm:$0xff] }
 0x15e   :  { %1082 = vmatpush1.msra.mxu1 %v751_v13  ;;  %v4453_v13 = vld [vmem:[#allocation31_spill] sm:$0xff] }
 0x15f   :  { %1083 = vmatprep.subr.mxu1 %v750_v36  ;;  %v689_v34 = vadd.f32 %v4453_v13, %v4451_v20  ;;  %v4454_v36 = vld [vmem:[#allocation11_spill] sm:$0xff]  ;;  %v788_v55 = vmax.f32 %v691_v29, 0.0  ;;  %v809_v20 = vld [vmem:[%s4368_s3 + $0x20] sm:$0xff] }
 0x160   :  { %1084 = vmatpush1.msra.mxu1 %v749_v6  ;;  %v685_v6 = vadd.f32 %v4455_v51, %v4454_v36  ;;  %v811_v29 = vld [vmem:[%s4368_s3 + $0x30] sm:$0xff]  ;;  %v813_v13 = vld [vmem:[%s4368_s3 + $0x40] sm:$0xff] }
 0x161   :  { %1085 = vmatprep.subr.mxu1 %v748_v46  ;;  %v4456_v46 = vld [vmem:[#allocation29_spill] sm:$0xff]  ;;  %v787_v54 = vmax.f32 %v689_v34, 0.0 }
 0x162   :  { %1086 = vmatpush1.msra.mxu1 %v747_v0  ;;  %v683_v52 = vadd.f32 %v4456_v46, %v4454_v36  ;;  %v789_v0 = vmax.f32 %v695_v27, 0.0  ;;  %v786_v40 = vmax.f32 %v685_v6, 0.0  ;;  %v807_v27 = vld [vmem:[%s4368_s3 + $0x10] sm:$0xff]  ;;  %v816_v34 = vld [vmem:[%s4368_s3 + $0x58] sm:$0xff]  ;;  %v818_v36 = vld [vmem:[%s4368_s3 + $0x68] sm:$0xff] }
 0x163   :  { %1087 = vmatprep.subr.mxu1 %v746_v22  ;;  %v679_v22 = vadd.f32 %v4458_v60, %v4457_v39  ;;  %v817_v51 = vld [vmem:[%s4368_s3 + $0x60] sm:$0xff]  ;;  %v820_v6 = vld [vmem:[%s4368_s3 + $0x78] sm:$0xff]  ;;  %v822_v46 = vld [vmem:[%s4368_s3 + $0x88] sm:$0xff] }
 0x164   :  { %1088 = vmatpush1.msra.mxu1 %v745_v57  ;;  %v4459_v57 = vld [vmem:[#allocation27_spill] sm:$0xff]  ;;  %v785_v61 = vmax.f32 %v683_v52, 0.0  ;;  %v821_v52 = vld [vmem:[%s4368_s3 + $0x80] sm:$0xff] }
 0x165   :  { %1089 = vmatprep.subr.mxu1 %v744_v53  ;;  %v677_v53 = vadd.f32 %v4459_v57, %v4457_v39  ;;  %v784_v62 = vmax.f32 %v679_v22, 0.0  ;;  %v823_v39 = vld [vmem:[%s4368_s3 + $0x90] sm:$0xff]  ;;  %v826_v60 = vld [vmem:[%s4368_s3 + $0xa8] sm:$0xff]  ;;  %v825_v22 = vld [vmem:[%s4368_s3 + $0xa0] sm:$0xff] }
 0x166   :  { %1090 = vmatpush1.msra.mxu1 %v743_v28  ;;  %v4460_v28 = vld [vmem:[#allocation13_spill] sm:$0xff]  ;;  %v827_v57 = vld [vmem:[%s4368_s3 + $0xb0] sm:$0xff] }
 0x167   :  { %1091 = vmatprep.subr.mxu1 %v742_v50  ;;  %v673_v50 = vadd.f32 %v4461_v58, %v4460_v28  ;;  %v783_v26 = vmax.f32 %v677_v53, 0.0  ;;  %v830_v53 = vld [vmem:[%s4368_s3 + $0xc8] sm:$0xff]  ;;  %v831_v58 = vld [vmem:[%s4368_s3 + $0xd0] sm:$0xff] }
 0x168   :  { %1092 = vmatpush1.msra.mxu1 %v741_v47  ;;  %v4462_v47 = vld [vmem:[#allocation25_spill] sm:$0xff] }
 0x169   :  { %1093 = vmatprep.subr.mxu1 %v804_v43  ;;  %v671_v25 = vadd.f32 %v4462_v47, %v4460_v28  ;;  %v4463_v43 = vld [vmem:[#allocation14_spill] sm:$0xff]  ;;  %v782_v32 = vmax.f32 %v673_v50, 0.0  ;;  %v832_v28 = vld [vmem:[%s4368_s3 + $0xd8] sm:$0xff] }
 0x16a   :  { %1094 = vmatpush2.msra.mxu1 %v803_v17  ;;  %v667_v17 = vadd.f32 %v4464_v44, %v4463_v43  ;;  %v834_v50 = vld [vmem:[%s4368_s3 + $0xe8] sm:$0xff]  ;;  %v836_v47 = vld [vmem:[%s4368_s3 + $0xf8] sm:$0xff] }
 0x16b   :  { %1095 = vmatprep.subr.mxu1 %v802_v33  ;;  %v4465_v33 = vld [vmem:[#allocation23_spill] sm:$0xff]  ;;  %v781_v4 = vmax.f32 %v671_v25, 0.0  ;;  %v840_v44 = vld [vmem:[%s4368_s3 + $0x118] sm:$0xff] }
 0x16c   :  { %1096 = vmatpush2.msra.mxu1 %v801_v1  ;;  %v665_v31 = vadd.f32 %v4465_v33, %v4463_v43  ;;  %v4466_v1 = vld [vmem:[#allocation15_spill] sm:$0xff]  ;;  %v780_v30 = vmax.f32 %v667_v17, 0.0  ;;  %v837_v43 = vld [vmem:[%s4368_s3 + $0x100] sm:$0xff] }
 0x16d   :  { %1097 = vmatprep.subr.mxu1 %v800_v11  ;;  %v661_v14 = vadd.f32 %v4467_v8, %v4466_v1  ;;  %v4468_v11 = vld [vmem:[#allocation21_spill] sm:$0xff]  ;;  %v835_v25 = vld [vmem:[%s4368_s3 + $0xf0] sm:$0xff] }
 0x16e   :  { %1098 = vmatpush2.msra.mxu1 %v799_v23  ;;  %v659_v18 = vadd.f32 %v4468_v11, %v4466_v1  ;;  %v4469_v23 = vld [vmem:[#allocation16_spill] sm:$0xff]  ;;  %v841_v33 = vld [vmem:[%s4368_s3 + $0x120] sm:$0xff]  ;;  %v846_v1 = vld [vmem:[%s4368_s3 + $0x148] sm:$0xff] }
 0x16f   :  { %1099 = vmatprep.subr.mxu1 %v798_v37  ;;  %v655_v35 = vadd.f32 %v4470_v21, %v4469_v23  ;;  %v214_v37 = vpop.permute.xlu1 %213  ;;  %v653_v7 = vadd.f32 %v4471_v59, %v4469_v23  ;;  %v778_v49 = vmax.f32 %v661_v14, 0.0  ;;  %v839_v17 = vld [vmem:[%s4368_s3 + $0x110] sm:$0xff]  ;;  %v845_v8 = vld [vmem:[%s4368_s3 + $0x140] sm:$0xff]  ;;  %v848_v14 = vld [vmem:[%s4368_s3 + $0x158] sm:$0xff] }
 0x170   :  { %1100 = vmatpush2.msra.mxu1 %v797_v38  ;;  %v779_v38 = vmax.f32 %v665_v31, 0.0  ;;  %v649_v63 = vadd.f32 %v4472_v56, %v214_v37  ;;  %v777_v5 = vmax.f32 %v659_v18, 0.0  ;;  %v844_v31 = vld [vmem:[%s4368_s3 + $0x138] sm:$0xff]  ;;  %v850_v11 = vld [vmem:[%s4368_s3 + $0x168] sm:$0xff]  ;;  %v849_v18 = vld [vmem:[%s4368_s3 + $0x160] sm:$0xff] }
 0x171   :  { %1101 = vmatprep.subr.mxu1 %v796_v2  ;;  %v4473_v2 = vld [vmem:[#allocation17_spill] sm:$0xff]  ;;  %v775_v12 = vmax.f32 %v653_v7, 0.0  ;;  %v851_v23 = vld [vmem:[%s4368_s3 + $0x170] sm:$0xff]  ;;  %v854_v21 = vld [vmem:[%s4368_s3 + $0x188] sm:$0xff] }
 0x172   :  { %1102 = vmatpush2.msra.mxu1 %v795_v9  ;;  %v647_v41 = vadd.f32 %v4473_v2, %v214_v37  ;;  %v776_v9 = vmax.f32 %v655_v35, 0.0  ;;  %v774_v42 = vmax.f32 %v649_v63, 0.0  ;;  %v853_v35 = vld [vmem:[%s4368_s3 + $0x180] sm:$0xff]  ;;  %v855_v37 = vld [vmem:[%s4368_s3 + $0x190] sm:$0xff]  ;;  %v858_v59 = vld [vmem:[%s4368_s3 + $0x1a8] sm:$0xff] }
 0x173   :  { %1103 = vmatprep.subr.mxu1 %v794_v19  ;;  %v805_v19 = vld [vmem:[%s4368_s3] sm:$0xff]  ;;  %v859_v56 = vld [vmem:[%s4368_s3 + $0x1b0] sm:$0xff]  ;;  %v862_v63 = vld [vmem:[%s4368_s3 + $0x1c8] sm:$0xff] }
 0x174   :  { %1104 = vmatpush2.msra.mxu1 %v793_v45  ;;  %v773_v15 = vmax.f32 %v647_v41, 0.0  ;;  %v810_v45 = vld [vmem:[%s4368_s3 + $0x28] sm:$0xff]  ;;  %v857_v7 = vld [vmem:[%s4368_s3 + $0x1a0] sm:$0xff]  ;;  %v864_v2 = vld [vmem:[%s4368_s3 + $0x1d8] sm:$0xff] }
 0x175   :  { %1105 = vmatprep.subr.mxu1 %v792_v48  ;;  %v814_v48 = vld [vmem:[%s4368_s3 + $0x48] sm:$0xff]  ;;  %v863_v41 = vld [vmem:[%s4368_s3 + $0x1d0] sm:$0xff] }
 0x176   :  { %1106 = vmatpush2.msra.mxu1 %v791_v10  ;;  %v815_v10 = vld [vmem:[%s4368_s3 + $0x50] sm:$0xff] }
 0x177   :  { %1107 = vmatprep.subr.mxu1 %v790_v3  ;;  %v819_v3 = vld [vmem:[%s4368_s3 + $0x70] sm:$0xff] }
 0x178   :  { %1108 = vmatpush2.msra.mxu1 %v789_v0  ;;  %v824_v0 = vld [vmem:[%s4368_s3 + $0x98] sm:$0xff] }
 0x179   :  { %1109 = vmatprep.subr.mxu1 %v788_v55  ;;  %v828_v55 = vld [vmem:[%s4368_s3 + $0xb8] sm:$0xff] }
 0x17a   :  { %1110 = vmatpush2.msra.mxu1 %v787_v54  ;;  %v829_v54 = vld [vmem:[%s4368_s3 + $0xc0] sm:$0xff] }
 0x17b   :  { %1111 = vmatprep.subr.mxu1 %v786_v40  ;;  %v833_v40 = vld [vmem:[%s4368_s3 + $0xe0] sm:$0xff] }
 0x17c   :  { %1112 = vmatpush2.msra.mxu1 %v785_v61  ;;  %v838_v61 = vld [vmem:[%s4368_s3 + $0x108] sm:$0xff] }
 0x17d   :  { %1113 = vmatprep.subr.mxu1 %v784_v62  ;;  %v842_v62 = vld [vmem:[%s4368_s3 + $0x128] sm:$0xff] }
 0x17e   :  { %1114 = vmatpush2.msra.mxu1 %v783_v26  ;;  %v843_v26 = vld [vmem:[%s4368_s3 + $0x130] sm:$0xff] }
 0x17f   :  { %1115 = vmatprep.subr.mxu1 %v782_v32  ;;  %v847_v32 = vld [vmem:[%s4368_s3 + $0x150] sm:$0xff] }
 0x180   :  { %1116 = vmatpush2.msra.mxu1 %v781_v4  ;;  %v852_v4 = vld [vmem:[%s4368_s3 + $0x178] sm:$0xff] }
 0x181   :  { %1117 = vmatprep.subr.mxu1 %v780_v30  ;;  %v856_v30 = vld [vmem:[%s4368_s3 + $0x198] sm:$0xff] }
 0x182   :  { %1118 = vmatpush2.msra.mxu1 %v779_v38  ;;  %v860_v38 = vld [vmem:[%s4368_s3 + $0x1b8] sm:$0xff] }
 0x183   :  { %1119 = vmatprep.subr.mxu1 %v778_v49  ;;  %v861_v49 = vld [vmem:[%s4368_s3 + $0x1c0] sm:$0xff] }
 0x184   :  { %1120 = vmatpush2.msra.mxu1 %v777_v5  ;;  %v866_v5 = vld [vmem:[%s4368_s3 + $0x1e8] sm:$0xff] }
 0x185   :  { %1121 = vmatprep.subr.mxu1 %v776_v9  ;;  %v865_v9 = vld [vmem:[%s4368_s3 + $0x1e0] sm:$0xff] }
 0x186   :  { %1122 = vmatpush2.msra.mxu1 %v775_v12  ;;  %v868_v12 = vld [vmem:[%s4368_s3 + $0x1f8] sm:$0xff] }
 0x187   :  { %1123 = vmatprep.subr.mxu1 %v774_v42  ;;  %v867_v42 = vld [vmem:[%s4368_s3 + $0x1f0] sm:$0xff] }
 0x188   :  { %1124 = vmatpush2.msra.mxu1 %v773_v15 }
 0x189   :  { %1126 = vmatmul.mubr.f32.vlgmr.msra.gmra.mxu1 %v805_v19 }
 0x18a   :  { %1131 = vmatprep.mubr.f32.mxu1 %v808_v24 }
 0x18d   :  { %1132 = vmatmul.mubr.f32.gmra.mxu1 %v807_v27 }
 0x18e   :  { %1137 = vmatprep.mubr.f32.mxu1 %v810_v45 }
 0x191   :  { %1138 = vmatmul.mubr.f32.gmra.mxu1 %v809_v20 }
 0x192   :  { %1143 = vmatprep.mubr.f32.mxu1 %v812_v16 }
 0x195   :  { %1144 = vmatmul.mubr.f32.gmra.mxu1 %v811_v29 }
 0x196   :  { %1149 = vmatprep.mubr.f32.mxu1 %v814_v48 }
 0x199   :  { %1150 = vmatmul.mubr.f32.gmra.mxu1 %v813_v13 }
 0x19a   :  { %1155 = vmatprep.mubr.f32.mxu1 %v816_v34 }
 0x19d   :  { %1156 = vmatmul.mubr.f32.gmra.mxu1 %v815_v10 }
 0x19e   :  { %1161 = vmatprep.mubr.f32.mxu1 %v818_v36 }
 0x1a1   :  { %1162 = vmatmul.mubr.f32.gmra.mxu1 %v817_v51 }
 0x1a2   :  { %1167 = vmatprep.mubr.f32.mxu1 %v820_v6 }
 0x1a5   :  { %1168 = vmatmul.mubr.f32.gmra.mxu1 %v819_v3 }
 0x1a6   :  { %1173 = vmatprep.mubr.f32.mxu1 %v822_v46 }
 0x1a9   :  { %1174 = vmatmul.mubr.f32.gmra.mxu1 %v821_v52  ;;  %v1383_v52 = vld [vmem:[%s4370_s5 + $0x8] sm:$0xff] }
 0x1aa   :  { %1179 = vmatprep.mubr.f32.mxu1 %v824_v0  ;;  %1702 = vmatprep.mubr.f32.mxu0 %v1383_v52 }
 0x1ad   :  { %1180 = vmatmul.mubr.f32.gmra.mxu1 %v823_v39 }
 0x1ae   :  { %1185 = vmatprep.mubr.f32.mxu1 %v826_v60 }
 0x1b1   :  { %1186 = vmatmul.mubr.f32.gmra.mxu1 %v825_v22 }
 0x1b2   :  { %1191 = vmatprep.mubr.f32.mxu1 %v828_v55 }
 0x1b5   :  { %1192 = vmatmul.mubr.f32.gmra.mxu1 %v827_v57 }
 0x1b6   :  { %1197 = vmatprep.mubr.f32.mxu1 %v830_v53  ;;  %v979_v53 = vpop.permute.xlu0 %978 }
 0x1b9   :  { %1198 = vmatmul.mubr.f32.gmra.mxu1 %v829_v54 }
 0x1ba   :  { %1203 = vmatprep.mubr.f32.mxu1 %v832_v28  ;;  %v974_v28 = vpop.permute.xlu1 %973 }
 0x1bd   :  { %1204 = vmatmul.mubr.f32.gmra.mxu1 %v831_v58 }
 0x1be   :  { %1209 = vmatprep.mubr.f32.mxu1 %v834_v50 }
 0x1c1   :  { %1210 = vmatmul.mubr.f32.gmra.mxu1 %v833_v40  ;;  %v969_v40 = vpop.permute.xlu0 %968 }
 0x1c2   :  { %1215 = vmatprep.mubr.f32.mxu1 %v836_v47 }
 0x1c5   :  { %1216 = vmatmul.mubr.f32.gmra.mxu1 %v835_v25  ;;  %v964_v25 = vpop.permute.xlu1 %963 }
 0x1c6   :  { %1221 = vmatprep.mubr.f32.mxu1 %v838_v61 }
 0x1c9   :  { %1222 = vmatmul.mubr.f32.gmra.mxu1 %v837_v43 }
 0x1ca   :  { %1227 = vmatprep.mubr.f32.mxu1 %v840_v44  ;;  %v959_v44 = vpop.permute.xlu0 %958 }
 0x1cd   :  { %1228 = vmatmul.mubr.f32.gmra.mxu1 %v839_v17 }
 0x1ce   :  { %1233 = vmatprep.mubr.f32.mxu1 %v842_v62  ;;  %v954_v62 = vpop.permute.xlu1 %953 }
 0x1d1   :  { %1234 = vmatmul.mubr.f32.gmra.mxu1 %v841_v33 }
 0x1d2   :  { %1239 = vmatprep.mubr.f32.mxu1 %v844_v31 }
 0x1d5   :  { %1240 = vmatmul.mubr.f32.gmra.mxu1 %v843_v26 }
 0x1d6   :  { %1245 = vmatprep.mubr.f32.mxu1 %v846_v1 }
 0x1d9   :  { %1246 = vmatmul.mubr.f32.gmra.mxu1 %v845_v8 }
 0x1da   :  { %1251 = vmatprep.mubr.f32.mxu1 %v848_v14  ;;  %v949_v14 = vpop.permute.xlu0 %948 }
 0x1dd   :  { %1252 = vmatmul.mubr.f32.gmra.mxu1 %v847_v32 }
 0x1de   :  { %1257 = vmatprep.mubr.f32.mxu1 %v850_v11 }
 0x1e1   :  { %1258 = vmatmul.mubr.f32.gmra.mxu1 %v849_v18 }
 0x1e2   :  { %1263 = vmatprep.mubr.f32.mxu1 %v852_v4 }
 0x1e5   :  { %1264 = vmatmul.mubr.f32.gmra.mxu1 %v851_v23  ;;  %v944_v23 = vpop.permute.xlu1 %943 }
 0x1e6   :  { %1269 = vmatprep.mubr.f32.mxu1 %v854_v21 }
 0x1e9   :  { %1270 = vmatmul.mubr.f32.gmra.mxu1 %v853_v35  ;;  %v934_v52 = vpop.permute.xlu1 %933 }
 0x1ea   :  { %1275 = vmatprep.mubr.f32.mxu1 %v856_v30 }
 0x1ed   :  { %1276 = vmatmul.mubr.f32.gmra.mxu1 %v855_v37 }
 0x1ee   :  { %1281 = vmatprep.mubr.f32.mxu1 %v858_v59 }
 0x1f1   :  { %1282 = vmatmul.mubr.f32.gmra.mxu1 %v857_v7 }
 0x1f2   :  { %1287 = vmatprep.mubr.f32.mxu1 %v860_v38 }
 0x1f5   :  { %1288 = vmatmul.mubr.f32.gmra.mxu1 %v859_v56 }
 0x1f6   :  { %1293 = vmatprep.mubr.f32.mxu1 %v862_v63 }
 0x1f9   :  { %1294 = vmatmul.mubr.f32.gmra.mxu1 %v861_v49 }
 0x1fa   :  { %1299 = vmatprep.mubr.f32.mxu1 %v864_v2  ;;  %v939_v2 = vpop.permute.xlu0 %938 }
 0x1fd   :  { %1300 = vmatmul.mubr.f32.gmra.mxu1 %v863_v41 }
 0x1fe   :  { %1305 = vmatprep.mubr.f32.mxu1 %v866_v5 }
 0x201   :  { %1306 = vmatmul.mubr.f32.gmra.mxu1 %v865_v9 }
 0x202   :  { %1311 = vmatprep.mubr.f32.mxu1 %v868_v12 }
 0x205   :  { %1312 = vmatmul.mubr.f32.gmra.mxu1 %v867_v42 }
 0x249   :  { %v3776_v15 = vpop.f32.mrf.mxu1 }
 0x24b   :  { %v3778_v19 = vpop.f32.mrf.mxu1 }
 0x24d   :  { %v3780_v24 = vpop.f32.mrf.mxu1 }
 0x24f   :  { %v3782_v27 = vpop.f32.mrf.mxu1 }
 0x251   :  { %v3784_v45 = vpop.f32.mrf.mxu1 }
 0x253   :  { %v3786_v20 = vpop.f32.mrf.mxu1 }
 0x255   :  { %v3788_v16 = vpop.f32.mrf.mxu1 }
 0x257   :  { %v3790_v29 = vpop.f32.mrf.mxu1 }
 0x259   :  { %v3792_v48 = vpop.f32.mrf.mxu1 }
 0x25b   :  { %v3794_v13 = vpop.f32.mrf.mxu1 }
 0x25d   :  { %v3796_v34 = vpop.f32.mrf.mxu1 }
 0x25f   :  { %v3798_v10 = vpop.f32.mrf.mxu1 }
 0x261   :  { %v3800_v36 = vpop.f32.mrf.mxu1 }
 0x263   :  { %v3802_v51 = vpop.f32.mrf.mxu1 }
 0x265   :  { %v3804_v6 = vpop.f32.mrf.mxu1 }
 0x267   :  { %v3806_v3 = vpop.f32.mrf.mxu1 }
 0x269   :  { %v3808_v46 = vpop.f32.mrf.mxu1 }
 0x26b   :  { %v3813_v0 = vpop.f32.mrf.mxu1 }
 0x26d   :  { %v1181_v39 = vpop.f32.mrf.mxu1 }
 0x26f   :  { %v1183_v60 = vpop.f32.mrf.mxu1 }
 0x271   :  { %v1187_v22 = vpop.f32.mrf.mxu1 }
 0x273   :  { %v1189_v55 = vpop.f32.mrf.mxu1 }
 0x274   :  { %v1190_v12 = vadd.f32 %v1189_v55, %v954_v62  ;;  %v929_v55 = vpop.permute.xlu0 %928 }
 0x275   :  { %v1193_v57 = vpop.f32.mrf.mxu1 }
 0x276   :  { %v1194_v41 = vadd.f32 %v1193_v57, %v959_v44  ;;  %v1178_v57 = vadd.f32 %v3813_v0, %v944_v23  ;;  %v1166_v0 = vadd.f32 %v3802_v51, %v934_v52 }
 0x277   :  { %v1195_v54 = vpop.f32.mrf.mxu1 }
 0x278   :  { %v1196_v63 = vadd.f32 %v1195_v54, %v959_v44  ;;  %v1182_v54 = vadd.f32 %v1181_v39, %v949_v14  ;;  %v924_v39 = vpop.permute.xlu1 %923 }
 0x279   :  { %v1199_v58 = vpop.f32.mrf.mxu1  ;;  %v1154_v51 = vadd.f32 %v3794_v13, %v924_v39 }
 0x27a   :  { %v1200_v7 = vadd.f32 %v1199_v58, %v964_v25 }
 0x27b   :  { %v1201_v50 = vpop.f32.mrf.mxu1 }
 0x27c   :  { %v1202_v37 = vadd.f32 %v1201_v50, %v964_v25  ;;  %v1184_v50 = vadd.f32 %v1183_v60, %v949_v14  ;;  %v1172_v60 = vadd.f32 %v3806_v3, %v939_v2  ;;  %v1160_v3 = vadd.f32 %v3798_v10, %v929_v55 }
 0x27d   :  { %v1205_v47 = vpop.f32.mrf.mxu1 }
 0x27e   :  { %v1206_v21 = vadd.f32 %v1205_v47, %v969_v40  ;;  %v1343_v42 = vmax.f32 %v1202_v37, 0.0  ;;  %v1340_v47 = vmax.f32 %v1194_v41, 0.0  ;;  %v1333_v14 = vmax.f32 %v1172_v60, 0.0 }
 0x27f   :  { %v1207_v61 = vpop.f32.mrf.mxu1 }
 0x280   :  { %v1208_v18 = vadd.f32 %v1207_v61, %v969_v40  ;;  %v1344_v5 = vmax.f32 %v1206_v21, 0.0  ;;  %v1341_v40 = vmax.f32 %v1196_v63, 0.0  ;;  %v1339_v61 = vmax.f32 %v1190_v12, 0.0 }
 0x281   :  { %v1211_v43 = vpop.f32.mrf.mxu1  ;;  %v1152_v21 = vadd.f32 %v3792_v48, %v924_v39  ;;  %v1327_v63 = vmax.f32 %v1154_v51, 0.0 }
 0x282   :  { %v1212_v32 = vadd.f32 %v1211_v43, %v974_v28  ;;  %v1345_v49 = vmax.f32 %v1208_v18, 0.0  ;;  %v1176_v43 = vadd.f32 %v3808_v46, %v944_v23  ;;  %v1164_v46 = vadd.f32 %v3800_v36, %v934_v52  ;;  %v914_v36 = vpop.permute.xlu1 %913 }
 0x283   :  { %v1213_v17 = vpop.f32.mrf.mxu1  ;;  %v1331_v23 = vmax.f32 %v1166_v0, 0.0  ;;  %v1142_v13 = vadd.f32 %v3786_v20, %v914_v36  ;;  %v1140_v48 = vadd.f32 %v3784_v45, %v914_v36 }
 0x284   :  { %v1214_v1 = vadd.f32 %v1213_v17, %v974_v28  ;;  %v1346_v38 = vmax.f32 %v1212_v32, 0.0  ;;  %v1342_v28 = vmax.f32 %v1200_v7, 0.0  ;;  %v1337_v17 = vmax.f32 %v1184_v50, 0.0  ;;  %v919_v32 = vpop.permute.xlu0 %918 }
 0x285   :  { %v1217_v33 = vpop.f32.mrf.mxu1  ;;  %v1148_v10 = vadd.f32 %v3790_v29, %v919_v32 }
 0x286   :  { %v1218_v31 = vadd.f32 %v1217_v33, %v979_v53  ;;  %v1347_v59 = vmax.f32 %v1214_v1, 0.0  ;;  %v1336_v33 = vmax.f32 %v1182_v54, 0.0  ;;  %v1334_v1 = vmax.f32 %v1176_v43, 0.0 }
 0x287   :  { %v1219_v26 = vpop.f32.mrf.mxu1 }
 0x288   :  { %v1220_v8 = vadd.f32 %v1219_v26, %v979_v53  ;;  %v1348_v35 = vmax.f32 %v1218_v31, 0.0  ;;  %v1188_v53 = vadd.f32 %v1187_v22, %v954_v62  ;;  %v1170_v62 = vadd.f32 %v3804_v6, %v939_v2 }
 0x289   :  { %v3815_v11 = vpop.f32.mrf.mxu1  ;;  %v1335_v26 = vmax.f32 %v1178_v57, 0.0  ;;  %v1158_v6 = vadd.f32 %v3796_v34, %v929_v55  ;;  %v1146_v34 = vadd.f32 %v3788_v16, %v919_v32  ;;  %v1326_v2 = vmax.f32 %v1152_v21, 0.0  ;;  %v904_v16 = vpop.permute.xlu1 %903 }
 0x28a   :  { %v1349_v4 = vmax.f32 %v1220_v8, 0.0  ;;  %v1338_v22 = vmax.f32 %v1188_v53, 0.0  ;;  %v1332_v18 = vmax.f32 %v1170_v62, 0.0  ;;  %v1130_v20 = vadd.f32 %v3778_v19, %v904_v16 }
 0x28b   :  { %v3817_v30 = vpop.f32.mrf.mxu1  ;;  %v1328_v7 = vmax.f32 %v1158_v6, 0.0  ;;  %v1323_v53 = vmax.f32 %v1142_v13, 0.0  ;;  %v1128_v45 = vadd.f32 %v3776_v15, %v904_v16 }
 0x28c   :  { %1638 = vmatprep.subr.mxu0 %v1349_v4 }
 0x28d   :  { %v3819_v56 = vpop.f32.mrf.mxu1  ;;  %1639 = vmatpush1.msra.mxu0 %v1348_v35  ;;  %v1330_v35 = vmax.f32 %v1164_v46, 0.0  ;;  %v1054_v39 = vpop.permute.xlu1 %1053 }
 0x28e   :  { %1640 = vmatprep.subr.mxu0 %v1347_v59  ;;  %v1329_v59 = vmax.f32 %v1160_v3, 0.0 }
 0x28f   :  { %v3821_v9 = vpop.f32.mrf.mxu1  ;;  %1641 = vmatpush1.msra.mxu0 %v1346_v38 }
 0x290   :  { %1642 = vmatprep.subr.mxu0 %v1345_v49  ;;  %v909_v49 = vpop.permute.xlu0 %908 }
 0x291   :  { %v3823_v58 = vpop.f32.mrf.mxu1  ;;  %1643 = vmatpush1.msra.mxu0 %v1344_v5  ;;  %v1136_v29 = vadd.f32 %v3782_v27, %v909_v49  ;;  %v1325_v5 = vmax.f32 %v1148_v10, 0.0  ;;  %v1134_v12 = vadd.f32 %v3780_v24, %v909_v49  ;;  %v1319_v24 = vmax.f32 %v1130_v20, 0.0  ;;  %v1044_v46 = vpop.permute.xlu1 %1043 }
 0x292   :  { %1644 = vmatprep.subr.mxu0 %v1343_v42  ;;  %v1324_v42 = vmax.f32 %v1146_v34, 0.0 }
 0x293   :  { %v3825_v25 = vpop.f32.mrf.mxu1  ;;  %1645 = vmatpush1.msra.mxu0 %v1342_v28  ;;  %v1322_v28 = vmax.f32 %v1140_v48, 0.0  ;;  %v1321_v27 = vmax.f32 %v1136_v29, 0.0 }
 0x294   :  { %1646 = vmatprep.subr.mxu0 %v1341_v40  ;;  %v1320_v40 = vmax.f32 %v1134_v12, 0.0  ;;  %v1059_v60 = vpop.permute.xlu0 %1058 }
 0x295   :  { %v3829_v44 = vpop.f32.mrf.mxu1  ;;  %1647 = vmatpush1.msra.mxu0 %v1340_v47  ;;  %v1318_v47 = vmax.f32 %v1128_v45, 0.0  ;;  %v1034_v6 = vpop.permute.xlu1 %1033 }
 0x296   :  { %1648 = vmatprep.subr.mxu0 %v1339_v61 }
 0x297   :  { %v3833_v31 = vpop.f32.mrf.mxu1  ;;  %1649 = vmatpush1.msra.mxu0 %v1338_v22 }
 0x298   :  { %1650 = vmatprep.subr.mxu0 %v1337_v17  ;;  %v1049_v0 = vpop.permute.xlu0 %1048 }
 0x299   :  { %v3837_v8 = vpop.f32.mrf.mxu1  ;;  %1651 = vmatpush1.msra.mxu0 %v1336_v33 }
 0x29a   :  { %1652 = vmatprep.subr.mxu0 %v1335_v26 }
 0x29b   :  { %v3841_v4 = vpop.f32.mrf.mxu1  ;;  %1653 = vmatpush1.msra.mxu0 %v1334_v1 }
 0x29c   :  { %1654 = vmatprep.subr.mxu0 %v1333_v14  ;;  %v1039_v14 = vpop.permute.xlu0 %1038 }
 0x29d   :  { %v3845_v37 = vpop.f32.mrf.mxu1  ;;  %1655 = vmatpush1.msra.mxu0 %v1332_v18 }
 0x29e   :  { %1656 = vmatprep.subr.mxu0 %v1331_v23 }
 0x29f   :  { %v3849_v38 = vpop.f32.mrf.mxu1  ;;  %1657 = vmatpush1.msra.mxu0 %v1330_v35 }
 0x2a0   :  { %1658 = vmatprep.subr.mxu0 %v1329_v59  ;;  %v1029_v35 = vpop.permute.xlu0 %1028 }
 0x2a1   :  { %v3853_v41 = vpop.f32.mrf.mxu1  ;;  %1659 = vmatpush1.msra.mxu0 %v1328_v7  ;;  %v1024_v7 = vpop.permute.xlu1 %1023 }
 0x2a2   :  { %1660 = vmatprep.subr.mxu0 %v1327_v63 }
 0x2a3   :  { %v3857_v52 = vpop.f32.mrf.mxu1  ;;  %1661 = vmatpush1.msra.mxu0 %v1326_v2 }
 0x2a4   :  { %1662 = vmatprep.subr.mxu0 %v1325_v5  ;;  %v1019_v12 = vpop.permute.xlu0 %1018 }
 0x2a5   :  { %v3861_v50 = vpop.f32.mrf.mxu1  ;;  %1663 = vmatpush1.msra.mxu0 %v1324_v42 }
 0x2a6   :  { %1664 = vmatprep.subr.mxu0 %v1323_v53 }
 0x2a7   :  { %v3863_v54 = vpop.f32.mrf.mxu1  ;;  %1665 = vmatpush1.msra.mxu0 %v1322_v28  ;;  %v1014_v28 = vpop.permute.xlu1 %1013 }
 0x2a8   :  { %1666 = vmatprep.subr.mxu0 %v1321_v27 }
 0x2a9   :  { %v3865_v57 = vpop.f32.mrf.mxu1  ;;  %1667 = vmatpush1.msra.mxu0 %v1320_v40 }
 0x2aa   :  { %1668 = vmatprep.subr.mxu0 %v1319_v24 }
 0x2ab   :  { %v1273_v19 = vpop.f32.mrf.mxu1  ;;  %1669 = vmatpush1.msra.mxu0 %v1318_v47 }
 0x2ad   :  { %v1277_v15 = vpop.f32.mrf.mxu1 }
 0x2af   :  { %v1279_v61 = vpop.f32.mrf.mxu1 }
 0x2b0   :  { %v1280_v24 = vadd.f32 %v1279_v61, %v1029_v35  ;;  %v1266_v61 = vadd.f32 %v3861_v50, %v1019_v12 }
 0x2b1   :  { %v1283_v55 = vpop.f32.mrf.mxu1 }
 0x2b2   :  { %v1284_v27 = vadd.f32 %v1283_v55, %v1034_v6  ;;  %v1004_v55 = vpop.permute.xlu1 %1003 }
 0x2b3   :  { %v1285_v43 = vpop.f32.mrf.mxu1  ;;  %v1250_v50 = vadd.f32 %v3841_v4, %v1004_v55 }
 0x2b4   :  { %v1286_v53 = vadd.f32 %v1285_v43, %v1034_v6  ;;  %v1268_v43 = vadd.f32 %v3863_v54, %v1019_v12  ;;  %v1364_v6 = vmax.f32 %v1266_v61, 0.0  ;;  %v1388_v12 = vld [vmem:[%s4370_s5 + $0x30] sm:$0xff] }
 0x2b5   :  { %v1289_v22 = vpop.f32.mrf.mxu1  ;;  %v1408_v61 = vld [vmem:[%s4370_s5 + $0xd0] sm:$0xff] }
 0x2b6   :  { %v1290_v42 = vadd.f32 %v1289_v22, %v1039_v14  ;;  %v1272_v22 = vadd.f32 %v3865_v57, %v1024_v7 }
 0x2b7   :  { %v1291_v17 = vpop.f32.mrf.mxu1 }
 0x2b8   :  { %v1292_v5 = vadd.f32 %v1291_v17, %v1039_v14  ;;  %v1274_v17 = vadd.f32 %v1273_v19, %v1024_v7  ;;  %v1260_v19 = vadd.f32 %v3853_v41, %v1014_v28  ;;  %v1365_v14 = vmax.f32 %v1268_v43, 0.0  ;;  %v1407_v43 = vld [vmem:[%s4370_s5 + $0xc8] sm:$0xff] }
 0x2b9   :  { %v1295_v62 = vpop.f32.mrf.mxu1 }
 0x2ba   :  { %v1296_v2 = vadd.f32 %v1295_v62, %v1044_v46  ;;  %v1373_v47 = vmax.f32 %v1292_v5, 0.0  ;;  %v1371_v62 = vmax.f32 %v1286_v53, 0.0  ;;  %v1386_v5 = vld [vmem:[%s4370_s5 + $0x20] sm:$0xff]  ;;  %v1393_v53 = vld [vmem:[%s4370_s5 + $0x58] sm:$0xff] }
 0x2bb   :  { %v1297_v33 = vpop.f32.mrf.mxu1 }
 0x2bc   :  { %v1298_v49 = vadd.f32 %v1297_v33, %v1044_v46  ;;  %v1374_v40 = vmax.f32 %v1296_v2, 0.0  ;;  %v1009_v33 = vpop.permute.xlu0 %1008 }
 0x2bd   :  { %v1301_v26 = vpop.f32.mrf.mxu1  ;;  %v1256_v57 = vadd.f32 %v3849_v38, %v1009_v33 }
 0x2be   :  { %v1302_v13 = vadd.f32 %v1301_v26, %v1049_v0  ;;  %v1375_v45 = vmax.f32 %v1298_v49, 0.0  ;;  %v1369_v26 = vmax.f32 %v1280_v24, 0.0  ;;  %v1396_v24 = vld [vmem:[%s4370_s5 + $0x70] sm:$0xff] }
 0x2bf   :  { %v1303_v1 = vpop.f32.mrf.mxu1 }
 0x2c0   :  { %v1304_v59 = vadd.f32 %v1303_v1, %v1049_v0  ;;  %v1376_v20 = vmax.f32 %v1302_v13, 0.0  ;;  %v1370_v0 = vmax.f32 %v1284_v27, 0.0  ;;  %v1367_v1 = vmax.f32 %v1274_v17, 0.0  ;;  %v999_v54 = vpop.permute.xlu0 %998  ;;  %v1394_v27 = vld [vmem:[%s4370_s5 + $0x60] sm:$0xff]  ;;  %v1400_v17 = vld [vmem:[%s4370_s5 + $0x90] sm:$0xff] }
 0x2c1   :  { %v1307_v3 = vpop.f32.mrf.mxu1  ;;  %v1244_v41 = vadd.f32 %v3833_v31, %v999_v54  ;;  %v1242_v38 = vadd.f32 %v3829_v44, %v999_v54  ;;  %v1416_v54 = vld [vmem:[%s4370_s5 + $0x110] sm:$0xff] }
 0x2c2   :  { %v1308_v10 = vadd.f32 %v1307_v3, %v1054_v39  ;;  %v1377_v16 = vmax.f32 %v1304_v59, 0.0  ;;  %v1366_v3 = vmax.f32 %v1272_v22, 0.0  ;;  %v1405_v22 = vld [vmem:[%s4370_s5 + $0xb8] sm:$0xff] }
 0x2c3   :  { %v1309_v32 = vpop.f32.mrf.mxu1  ;;  %v1356_v13 = vmax.f32 %v1242_v38, 0.0  ;;  %v1426_v38 = vld [vmem:[%s4370_s5 + $0x160] sm:$0xff] }
 0x2c4   :  { %v1310_v36 = vadd.f32 %v1309_v32, %v1054_v39  ;;  %v1378_v29 = vmax.f32 %v1308_v10, 0.0  ;;  %v1372_v39 = vmax.f32 %v1290_v42, 0.0  ;;  %v1254_v32 = vadd.f32 %v3845_v37, %v1009_v33  ;;  %v989_v4 = vpop.permute.xlu0 %988  ;;  %v1391_v42 = vld [vmem:[%s4370_s5 + $0x48] sm:$0xff]  ;;  %v1402_v33 = vld [vmem:[%s4370_s5 + $0xa0] sm:$0xff] }
 0x2c5   :  { %v1313_v18 = vpop.f32.mrf.mxu1  ;;  %v1230_v7 = vadd.f32 %v3819_v56, %v989_v4  ;;  %v1382_v56 = vld [vmem:[%s4370_s5] sm:$0xff] }
 0x2c6   :  { %v1314_v51 = vadd.f32 %v1313_v18, %v1059_v60  ;;  %v1379_v48 = vmax.f32 %v1310_v36, 0.0  ;;  %v1361_v36 = vmax.f32 %v1256_v57, 0.0  ;;  %v1414_v57 = vld [vmem:[%s4370_s5 + $0x100] sm:$0xff] }
 0x2c7   :  { %v1315_v23 = vpop.f32.mrf.mxu1 }
 0x2c8   :  { %v1316_v21 = vadd.f32 %v1315_v23, %v1059_v60  ;;  %v1380_v63 = vmax.f32 %v1314_v51, 0.0  ;;  %v1278_v60 = vadd.f32 %v1277_v15, %v1029_v35  ;;  %v1262_v15 = vadd.f32 %v3857_v52, %v1014_v28  ;;  %v994_v52 = vpop.permute.xlu1 %993  ;;  %v1395_v28 = vld [vmem:[%s4370_s5 + $0x68] sm:$0xff] }
 0x2c9   :  { %v1248_v51 = vadd.f32 %v3837_v8, %v1004_v55  ;;  %v1362_v23 = vmax.f32 %v1260_v19, 0.0  ;;  %v1238_v37 = vadd.f32 %v3825_v25, %v994_v52  ;;  %v1359_v35 = vmax.f32 %v1250_v50, 0.0  ;;  %v1409_v55 = vld [vmem:[%s4370_s5 + $0xd8] sm:$0xff]  ;;  %v1412_v19 = vld [vmem:[%s4370_s5 + $0xf0] sm:$0xff] }
 0x2ca   :  { %v1381_v34 = vmax.f32 %v1316_v21, 0.0  ;;  %v1368_v46 = vmax.f32 %v1278_v60, 0.0  ;;  %v1363_v18 = vmax.f32 %v1262_v15, 0.0  ;;  %v1360_v21 = vmax.f32 %v1254_v32, 0.0  ;;  %v1398_v60 = vld [vmem:[%s4370_s5 + $0x80] sm:$0xff]  ;;  %v1419_v32 = vld [vmem:[%s4370_s5 + $0x128] sm:$0xff] }
 0x2cb   :  { %v1236_v10 = vadd.f32 %v3823_v58, %v994_v52  ;;  %v1358_v59 = vmax.f32 %v1248_v51, 0.0  ;;  %v1232_v8 = vadd.f32 %v3821_v9, %v989_v4  ;;  %v1410_v15 = vld [vmem:[%s4370_s5 + $0xe0] sm:$0xff]  ;;  %v1421_v50 = vld [vmem:[%s4370_s5 + $0x138] sm:$0xff]  ;;  %v1423_v52 = vld [vmem:[%s4370_s5 + $0x148] sm:$0xff] }
 0x2cc   :  { %1670 = vmatprep.subr.mxu0 %v1381_v34  ;;  %v1357_v34 = vmax.f32 %v1244_v41, 0.0  ;;  %v984_v31 = vpop.permute.xlu1 %983  ;;  %v1422_v51 = vld [vmem:[%s4370_s5 + $0x140] sm:$0xff]  ;;  %v1424_v41 = vld [vmem:[%s4370_s5 + $0x150] sm:$0xff] }
 0x2cd   :  { %1671 = vmatpush2.msra.mxu0 %v1380_v63  ;;  %v1226_v44 = vadd.f32 %v3817_v30, %v984_v31  ;;  %v1355_v63 = vmax.f32 %v1238_v37, 0.0  ;;  %v1224_v25 = vadd.f32 %v3815_v11, %v984_v31  ;;  %v1354_v49 = vmax.f32 %v1236_v10, 0.0  ;;  %v1385_v30 = vld [vmem:[%s4370_s5 + $0x18] sm:$0xff]  ;;  %v1384_v11 = vld [vmem:[%s4370_s5 + $0x10] sm:$0xff]  ;;  %v1430_v4 = vld [vmem:[%s4370_s5 + $0x180] sm:$0xff] }
 0x2ce   :  { %1672 = vmatprep.subr.mxu0 %v1379_v48  ;;  %v1353_v58 = vmax.f32 %v1232_v8, 0.0  ;;  %v1352_v48 = vmax.f32 %v1230_v7, 0.0  ;;  %v1428_v37 = vld [vmem:[%s4370_s5 + $0x170] sm:$0xff]  ;;  %v1433_v10 = vld [vmem:[%s4370_s5 + $0x198] sm:$0xff]  ;;  %v1435_v8 = vld [vmem:[%s4370_s5 + $0x1a8] sm:$0xff] }
 0x2cf   :  { %1673 = vmatpush2.msra.mxu0 %v1378_v29  ;;  %v1351_v9 = vmax.f32 %v1226_v44, 0.0  ;;  %v1350_v2 = vmax.f32 %v1224_v25, 0.0  ;;  %v1387_v29 = vld [vmem:[%s4370_s5 + $0x28] sm:$0xff]  ;;  %v1437_v31 = vld [vmem:[%s4370_s5 + $0x1b8] sm:$0xff]  ;;  %v1436_v7 = vld [vmem:[%s4370_s5 + $0x1b0] sm:$0xff] }
 0x2d0   :  { %1674 = vmatprep.subr.mxu0 %v1377_v16  ;;  %v1389_v16 = vld [vmem:[%s4370_s5 + $0x38] sm:$0xff]  ;;  %v1438_v44 = vld [vmem:[%s4370_s5 + $0x1c0] sm:$0xff]  ;;  %v1440_v25 = vld [vmem:[%s4370_s5 + $0x1d0] sm:$0xff] }
 0x2d1   :  { %1675 = vmatpush2.msra.mxu0 %v1376_v20  ;;  %v1390_v20 = vld [vmem:[%s4370_s5 + $0x40] sm:$0xff] }
 0x2d2   :  { %1676 = vmatprep.subr.mxu0 %v1375_v45  ;;  %v1392_v45 = vld [vmem:[%s4370_s5 + $0x50] sm:$0xff] }
 0x2d3   :  { %1677 = vmatpush2.msra.mxu0 %v1374_v40  ;;  %v1397_v40 = vld [vmem:[%s4370_s5 + $0x78] sm:$0xff] }
 0x2d4   :  { %1678 = vmatprep.subr.mxu0 %v1373_v47  ;;  %v1399_v47 = vld [vmem:[%s4370_s5 + $0x88] sm:$0xff] }
 0x2d5   :  { %1679 = vmatpush2.msra.mxu0 %v1372_v39  ;;  %v1401_v39 = vld [vmem:[%s4370_s5 + $0x98] sm:$0xff] }
 0x2d6   :  { %1680 = vmatprep.subr.mxu0 %v1371_v62  ;;  %v1403_v62 = vld [vmem:[%s4370_s5 + $0xa8] sm:$0xff] }
 0x2d7   :  { %1681 = vmatpush2.msra.mxu0 %v1370_v0  ;;  %v1404_v0 = vld [vmem:[%s4370_s5 + $0xb0] sm:$0xff] }
 0x2d8   :  { %1682 = vmatprep.subr.mxu0 %v1369_v26  ;;  %v1406_v26 = vld [vmem:[%s4370_s5 + $0xc0] sm:$0xff] }
 0x2d9   :  { %1683 = vmatpush2.msra.mxu0 %v1368_v46  ;;  %v1411_v46 = vld [vmem:[%s4370_s5 + $0xe8] sm:$0xff] }
 0x2da   :  { %1684 = vmatprep.subr.mxu0 %v1367_v1  ;;  %v1413_v1 = vld [vmem:[%s4370_s5 + $0xf8] sm:$0xff] }
 0x2db   :  { %1685 = vmatpush2.msra.mxu0 %v1366_v3  ;;  %v1415_v3 = vld [vmem:[%s4370_s5 + $0x108] sm:$0xff] }
 0x2dc   :  { %1686 = vmatprep.subr.mxu0 %v1365_v14  ;;  %v1417_v14 = vld [vmem:[%s4370_s5 + $0x118] sm:$0xff] }
 0x2dd   :  { %1687 = vmatpush2.msra.mxu0 %v1364_v6  ;;  %v1418_v6 = vld [vmem:[%s4370_s5 + $0x120] sm:$0xff] }
 0x2de   :  { %1688 = vmatprep.subr.mxu0 %v1363_v18  ;;  %v1420_v18 = vld [vmem:[%s4370_s5 + $0x130] sm:$0xff] }
 0x2df   :  { %1689 = vmatpush2.msra.mxu0 %v1362_v23  ;;  %v1425_v23 = vld [vmem:[%s4370_s5 + $0x158] sm:$0xff] }
 0x2e0   :  { %1690 = vmatprep.subr.mxu0 %v1361_v36  ;;  %v1427_v36 = vld [vmem:[%s4370_s5 + $0x168] sm:$0xff] }
 0x2e1   :  { %1691 = vmatpush2.msra.mxu0 %v1360_v21  ;;  %v1429_v21 = vld [vmem:[%s4370_s5 + $0x178] sm:$0xff] }
 0x2e2   :  { %1692 = vmatprep.subr.mxu0 %v1359_v35  ;;  %v1431_v35 = vld [vmem:[%s4370_s5 + $0x188] sm:$0xff] }
 0x2e3   :  { %1693 = vmatpush2.msra.mxu0 %v1358_v59  ;;  %v1432_v59 = vld [vmem:[%s4370_s5 + $0x190] sm:$0xff] }
 0x2e4   :  { %1694 = vmatprep.subr.mxu0 %v1357_v34  ;;  %v1434_v34 = vld [vmem:[%s4370_s5 + $0x1a0] sm:$0xff] }
 0x2e5   :  { %1695 = vmatpush2.msra.mxu0 %v1356_v13  ;;  %v1439_v13 = vld [vmem:[%s4370_s5 + $0x1c8] sm:$0xff] }
 0x2e6   :  { %1696 = vmatprep.subr.mxu0 %v1355_v63  ;;  %v1441_v63 = vld [vmem:[%s4370_s5 + $0x1d8] sm:$0xff] }
 0x2e7   :  { %1697 = vmatpush2.msra.mxu0 %v1354_v49  ;;  %v1443_v49 = vld [vmem:[%s4370_s5 + $0x1e8] sm:$0xff] }
 0x2e8   :  { %1698 = vmatprep.subr.mxu0 %v1353_v58  ;;  %v1442_v58 = vld [vmem:[%s4370_s5 + $0x1e0] sm:$0xff] }
 0x2e9   :  { %1699 = vmatpush2.msra.mxu0 %v1352_v48  ;;  %v1445_v48 = vld [vmem:[%s4370_s5 + $0x1f8] sm:$0xff] }
 0x2ea   :  { %1700 = vmatprep.subr.mxu0 %v1351_v9  ;;  %v1444_v9 = vld [vmem:[%s4370_s5 + $0x1f0] sm:$0xff]  ;;  %s2559_s5 = smov [#allocation3]  }
 0x2eb   :  { %1701 = vmatpush2.msra.mxu0 %v1350_v2  ;;  %v4073_v2 = vpop.permute.xlu0 %1480  ;;  %s2330_s12 = sshll.u32 %s2559_s5, 4  ;;  %s2331_s12 = int_to_ptr.vmem [resolvable:$true] %s2330_s12 }
 0x2ec   :  { %1703 = vmatmul.mubr.f32.vlgmr.msra.gmra.mxu0 %v1382_v56  ;;  %v4075_v56 = vpop.permute.xlu1 %1485  ;;  %s2535_s6 = scalar_lea.vmem %s2331_s12, 32  ;;  %p2540_p1 = scmp.lt.s32.totalorder %s2331_s12, %s2331_s12 }
 0x2ed   :  { %1708 = vmatprep.mubr.f32.mxu0 %v1385_v30  ;;  %p2536_p0 = scmp.ne.s32.totalorder %s2331_s12, %s2535_s6  ;;  %p2541_p2 = scmp.lt.s32.totalorder %s2535_s6, %s2535_s6 }
 0x2ef   :  { %v4077_v30 = vpop.permute.xlu0 %1490  ;;  %p2542_p3 = por %p2541_p2, %p2540_p1 }
 0x2f0   :  { %1709 = vmatmul.mubr.f32.gmra.mxu0 %v1384_v11  ;;  %v4079_v11 = vpop.permute.xlu1 %1495 }
 0x2f1   :  { %1714 = vmatprep.mubr.f32.mxu0 %v1387_v29  ;;  %p2543_p4 = pnand %p2542_p3, %p2536_p0 }
 0x2f3   :  { %v4081_v29 = vpop.permute.xlu0 %1500 }
 0x2f4   :  { %1715 = vmatmul.mubr.f32.gmra.mxu0 %v1386_v5  ;;  %v4083_v5 = vpop.permute.xlu1 %1505 }
 0x2f5   :  { %1720 = vmatprep.mubr.f32.mxu0 %v1389_v16 }
 0x2f7   :  { %v4085_v16 = vpop.permute.xlu0 %1510 }
 0x2f8   :  { %1721 = vmatmul.mubr.f32.gmra.mxu0 %v1388_v12  ;;  %v4087_v12 = vpop.permute.xlu1 %1515 }
 0x2f9   :  { %1726 = vmatprep.mubr.f32.mxu0 %v1391_v42 }
 0x2fb   :  { %v4089_v42 = vpop.permute.xlu0 %1520 }
 0x2fc   :  { %1727 = vmatmul.mubr.f32.gmra.mxu0 %v1390_v20  ;;  %v4091_v20 = vpop.permute.xlu1 %1525 }
 0x2fd   :  { %1732 = vmatprep.mubr.f32.mxu0 %v1393_v53 }
 0x2ff   :  { %v4093_v53 = vpop.permute.xlu0 %1530 }
 0x300   :  { %1733 = vmatmul.mubr.f32.gmra.mxu0 %v1392_v45  ;;  %v4095_v45 = vpop.permute.xlu1 %1535 }
 0x301   :  { %1738 = vmatprep.mubr.f32.mxu0 %v1395_v28 }
 0x303   :  { %v4097_v28 = vpop.permute.xlu0 %1540 }
 0x304   :  { %1739 = vmatmul.mubr.f32.gmra.mxu0 %v1394_v27  ;;  %v4099_v27 = vpop.permute.xlu1 %1545 }
 0x305   :  { %1744 = vmatprep.mubr.f32.mxu0 %v1397_v40 }
 0x307   :  { %v4101_v40 = vpop.permute.xlu0 %1550 }
 0x308   :  { %1745 = vmatmul.mubr.f32.gmra.mxu0 %v1396_v24  ;;  %4474 = vst [vmem:[#allocation41_spill] sm:$0xff] %v4101_v40  ;;  %v4103_v24 = vpop.permute.xlu1 %1555 }
 0x309   :  { %1750 = vmatprep.mubr.f32.mxu0 %v1399_v47  ;;  %4475 = vst [vmem:[#allocation6_spill] sm:$0xff] %v4103_v24 }
 0x30b   :  { %v4105_v47 = vpop.permute.xlu0 %1560 }
 0x30c   :  { %1751 = vmatmul.mubr.f32.gmra.mxu0 %v1398_v60  ;;  %4476 = vst [vmem:[#allocation40_spill] sm:$0xff] %v4105_v47  ;;  %v4107_v60 = vpop.permute.xlu1 %1565 }
 0x30d   :  { %1756 = vmatprep.mubr.f32.mxu0 %v1401_v39  ;;  %4477 = vst [vmem:[#allocation39_spill] sm:$0xff] %v4107_v60 }
 0x30f   :  { %v4109_v39 = vpop.permute.xlu0 %1570 }
 0x310   :  { %1757 = vmatmul.mubr.f32.gmra.mxu0 %v1400_v17  ;;  %4478 = vst [vmem:[#allocation7_spill] sm:$0xff] %v4109_v39  ;;  %v4111_v17 = vpop.permute.xlu1 %1575 }
 0x311   :  { %1762 = vmatprep.mubr.f32.mxu0 %v1403_v62  ;;  %4479 = vst [vmem:[#allocation38_spill] sm:$0xff] %v4111_v17 }
 0x313   :  { %v4113_v62 = vpop.permute.xlu0 %1580 }
 0x314   :  { %1763 = vmatmul.mubr.f32.gmra.mxu0 %v1402_v33  ;;  %4480 = vst [vmem:[#allocation37_spill] sm:$0xff] %v4113_v62 }
 0x315   :  { %1768 = vmatprep.mubr.f32.mxu0 %v1405_v22  ;;  %v4115_v22 = vpop.permute.xlu1 %1585 }
 0x316   :  { %4481 = vst [vmem:[#allocation8_spill] sm:$0xff] %v4115_v22 }
 0x318   :  { %1769 = vmatmul.mubr.f32.gmra.mxu0 %v1404_v0 }
 0x319   :  { %1774 = vmatprep.mubr.f32.mxu0 %v1407_v43  ;;  %v4117_v43 = vpop.permute.xlu0 %1590 }
 0x31a   :  { %4482 = vst [vmem:[#allocation36_spill] sm:$0xff] %v4117_v43 }
 0x31c   :  { %1775 = vmatmul.mubr.f32.gmra.mxu0 %v1406_v26 }
 0x31d   :  { %1780 = vmatprep.mubr.f32.mxu0 %v1409_v55 }
 0x320   :  { %1781 = vmatmul.mubr.f32.gmra.mxu0 %v1408_v61  ;;  %v4119_v61 = vpop.permute.xlu1 %1595 }
 0x321   :  { %1786 = vmatprep.mubr.f32.mxu0 %v1411_v46  ;;  %4483 = vst [vmem:[#allocation35_spill] sm:$0xff] %v4119_v61 }
 0x324   :  { %1787 = vmatmul.mubr.f32.gmra.mxu0 %v1410_v15  ;;  %v4121_v15 = vpop.permute.xlu0 %1600 }
 0x325   :  { %1792 = vmatprep.mubr.f32.mxu0 %v1413_v1  ;;  %4484 = vst [vmem:[#allocation9_spill] sm:$0xff] %v4121_v15 }
 0x328   :  { %1793 = vmatmul.mubr.f32.gmra.mxu0 %v1412_v19 }
 0x329   :  { %1798 = vmatprep.mubr.f32.mxu0 %v1415_v3  ;;  %v4123_v3 = vpop.permute.xlu1 %1605 }
 0x32a   :  { %4485 = vst [vmem:[#allocation34_spill] sm:$0xff] %v4123_v3 }
 0x32c   :  { %1799 = vmatmul.mubr.f32.gmra.mxu0 %v1414_v57 }
 0x32d   :  { %1804 = vmatprep.mubr.f32.mxu0 %v1417_v14  ;;  %v4125_v14 = vpop.permute.xlu0 %1610 }
 0x32e   :  { %4486 = vst [vmem:[#allocation33_spill] sm:$0xff] %v4125_v14 }
 0x330   :  { %1805 = vmatmul.mubr.f32.gmra.mxu0 %v1416_v54 }
 0x331   :  { %1810 = vmatprep.mubr.f32.mxu0 %v1419_v32 }
 0x334   :  { %1811 = vmatmul.mubr.f32.gmra.mxu0 %v1418_v6  ;;  %v4127_v6 = vpop.permute.xlu1 %1615 }
 0x335   :  { %1816 = vmatprep.mubr.f32.mxu0 %v1421_v50  ;;  %4487 = vst [vmem:[#allocation10_spill] sm:$0xff] %v4127_v6 }
 0x338   :  { %1817 = vmatmul.mubr.f32.gmra.mxu0 %v1420_v18  ;;  %v1994_v18 = vpop.permute.xlu0 %1993 }
 0x339   :  { %1822 = vmatprep.mubr.f32.mxu0 %v1423_v52 }
 0x33c   :  { %1823 = vmatmul.mubr.f32.gmra.mxu0 %v1422_v51 }
 0x33d   :  { %1828 = vmatprep.mubr.f32.mxu0 %v1425_v23  ;;  %v1999_v23 = vpop.permute.xlu1 %1998 }
 0x340   :  { %1829 = vmatmul.mubr.f32.gmra.mxu0 %v1424_v41 }
 0x341   :  { %1834 = vmatprep.mubr.f32.mxu0 %v1427_v36  ;;  %v2004_v36 = vpop.permute.xlu0 %2003 }
 0x344   :  { %1835 = vmatmul.mubr.f32.gmra.mxu0 %v1426_v38 }
 0x345   :  { %1840 = vmatprep.mubr.f32.mxu0 %v1429_v21 }
 0x348   :  { %1841 = vmatmul.mubr.f32.gmra.mxu0 %v1428_v37  ;;  %v4135_v37 = vpop.permute.xlu1 %2008 }
 0x349   :  { %1846 = vmatprep.mubr.f32.mxu0 %v1431_v35 }
 0x34c   :  { %1847 = vmatmul.mubr.f32.gmra.mxu0 %v1430_v4  ;;  %v4139_v4 = vpop.permute.xlu0 %2013 }
 0x34d   :  { %1852 = vmatprep.mubr.f32.mxu0 %v1433_v10 }
 0x350   :  { %1853 = vmatmul.mubr.f32.gmra.mxu0 %v1432_v59 }
 0x351   :  { %1858 = vmatprep.mubr.f32.mxu0 %v1435_v8  ;;  %v4145_v8 = vpop.permute.xlu1 %2018 }
 0x354   :  { %1859 = vmatmul.mubr.f32.gmra.mxu0 %v1434_v34 }
 0x355   :  { %1864 = vmatprep.mubr.f32.mxu0 %v1437_v31  ;;  %v4149_v31 = vpop.permute.xlu0 %2023 }
 0x358   :  { %1865 = vmatmul.mubr.f32.gmra.mxu0 %v1436_v7 }
 0x359   :  { %1870 = vmatprep.mubr.f32.mxu0 %v1439_v13 }
 0x35c   :  { %1871 = vmatmul.mubr.f32.gmra.mxu0 %v1438_v44  ;;  %v4155_v44 = vpop.permute.xlu1 %2028 }
 0x35d   :  { %1876 = vmatprep.mubr.f32.mxu0 %v1441_v63 }
 0x360   :  { %1877 = vmatmul.mubr.f32.gmra.mxu0 %v1440_v25  ;;  %v4159_v25 = vpop.permute.xlu0 %2033 }
 0x361   :  { %1882 = vmatprep.mubr.f32.mxu0 %v1443_v49 }
 0x364   :  { %1883 = vmatmul.mubr.f32.gmra.mxu0 %v1442_v58  ;;  %v4169_v6 = vpop.permute.xlu0 %2043 }
 0x365   :  { %1888 = vmatprep.mubr.f32.mxu0 %v1445_v48  ;;  %v4165_v48 = vpop.permute.xlu1 %2038 }
 0x368   :  { %1889 = vmatmul.mubr.f32.gmra.mxu0 %v1444_v9  ;;  %v4186_v40 = vpop.permute.xlu0 %2053 }
 0x369   :  { %v4180_v17 = vpop.permute.xlu1 %2048  ;;  %4490 = vst [vmem:[#allocation11_spill] sm:$0xff] %v4186_v40 }
 0x36a   :  { %4489 = vst [vmem:[#allocation31_spill] sm:$0xff] %v4180_v17 }
 0x36d   :  { %v4196_v40 = vpop.permute.xlu1 %2058 }
 0x3ac   :  { %v1704_v33 = vpop.f32.mrf.mxu0 }
 0x3ad   :  { %v1705_v15 = vadd.f32 %v1704_v33, %v4073_v2 }
 0x3ae   :  { %v1706_v0 = vpop.f32.mrf.mxu0 }
 0x3af   :  { %v1707_v62 = vadd.f32 %v1706_v0, %v4073_v2  ;;  %v1895_v24 = vmax.f32 %v1705_v15, 0.0 }
 0x3b0   :  { %v1710_v26 = vpop.f32.mrf.mxu0 }
 0x3b1   :  { %v1711_v14 = vadd.f32 %v1710_v26, %v4075_v56  ;;  %v1896_v2 = vmax.f32 %v1707_v62, 0.0 }
 0x3b2   :  { %v1712_v55 = vpop.f32.mrf.mxu0 }
 0x3b3   :  { %v1713_v61 = vadd.f32 %v1712_v55, %v4075_v56  ;;  %v1897_v39 = vmax.f32 %v1711_v14, 0.0 }
 0x3b4   :  { %v1716_v46 = vpop.f32.mrf.mxu0 }
 0x3b5   :  { %v1717_v43 = vadd.f32 %v1716_v46, %v4077_v30  ;;  %v1898_v33 = vmax.f32 %v1713_v61, 0.0  ;;  %v2153_v0 = vmul.f32 %v1999_v23, %v1897_v39 }
 0x3b6   :  { %v1718_v1 = vpop.f32.mrf.mxu0 }
 0x3b7   :  { %v1719_v60 = vadd.f32 %v1718_v1, %v4077_v30  ;;  %v1899_v56 = vmax.f32 %v1717_v43, 0.0  ;;  %v2154_v43 = vmul.f32 %v1999_v23, %v1898_v33 }
 0x3b8   :  { %v1722_v19 = vpop.f32.mrf.mxu0 }
 0x3b9   :  { %v1723_v47 = vadd.f32 %v1722_v19, %v4079_v11  ;;  %v1900_v14 = vmax.f32 %v1719_v60, 0.0  ;;  %v2151_v19 = vmul.f32 %v1994_v18, %v1895_v24  ;;  %v2155_v61 = vmul.f32 %v2004_v36, %v1899_v56  ;;  %v4202_v60 = vpop.permute.xlu0 %2063 }
 0x3ba   :  { %v1724_v57 = vpop.f32.mrf.mxu0 }
 0x3bb   :  { %v1725_v55 = vadd.f32 %v1724_v57, %v4079_v11  ;;  %v1901_v17 = vmax.f32 %v1723_v47, 0.0  ;;  %v2156_v62 = vmul.f32 %v2004_v36, %v1900_v14 }
 0x3bc   :  { %v1728_v54 = vpop.f32.mrf.mxu0 }
 0x3bd   :  { %v1729_v46 = vadd.f32 %v1728_v54, %v4081_v29  ;;  %v1902_v11 = vmax.f32 %v1725_v55, 0.0  ;;  %v2157_v24 = vmul.f32 %v4135_v37, %v1901_v17 }
 0x3be   :  { %v1730_v32 = vpop.f32.mrf.mxu0 }
 0x3bf   :  { %v1731_v30 = vadd.f32 %v1730_v32, %v4081_v29  ;;  %v1903_v57 = vmax.f32 %v1729_v46, 0.0  ;;  %v2215_v29 = vadd.f32 %v2153_v0, %v2151_v19 }
 0x3c0   :  { %v1734_v50 = vpop.f32.mrf.mxu0 }
 0x3c1   :  { %v1735_v15 = vadd.f32 %v1734_v50, %v4083_v5  ;;  %v1904_v32 = vmax.f32 %v1731_v30, 0.0 }
 0x3c2   :  { %v1736_v52 = vpop.f32.mrf.mxu0 }
 0x3c3   :  { %v1737_v39 = vadd.f32 %v1736_v52, %v4083_v5  ;;  %v1905_v23 = vmax.f32 %v1735_v15, 0.0  ;;  %v2216_v5 = vadd.f32 %v2215_v29, %v2155_v61  ;;  %v2158_v52 = vmul.f32 %v4135_v37, %v1902_v11  ;;  %v4227_v15 = vpop.permute.xlu0 %2073 }
 0x3c4   :  { %v1740_v51 = vpop.f32.mrf.mxu0 }
 0x3c5   :  { %v1741_v47 = vadd.f32 %v1740_v51, %v4085_v16  ;;  %v2159_v51 = vmul.f32 %v4139_v4, %v1903_v57  ;;  %v1906_v36 = vmax.f32 %v1737_v39, 0.0  ;;  %v2161_v37 = vmul.f32 %v4145_v8, %v1905_v23 }
 0x3c6   :  { %v4129_v41 = vpop.f32.mrf.mxu0 }
 0x3c7   :  { %v1743_v33 = vadd.f32 %v4129_v41, %v4085_v16  ;;  %v1907_v17 = vmax.f32 %v1741_v47, 0.0  ;;  %v4219_v16 = vpop.permute.xlu1 %2068 }
 0x3c8   :  { %v4131_v38 = vpop.f32.mrf.mxu0 }
 0x3c9   :  { %v1908_v14 = vmax.f32 %v1743_v33, 0.0  ;;  %v2163_v61 = vmul.f32 %v4149_v31, %v1907_v17 }
 0x3ca   :  { %v4133_v21 = vpop.f32.mrf.mxu0 }
 0x3cb   :  { %v1749_v46 = vadd.f32 %v4133_v21, %v4087_v12 }
 0x3cc   :  { %v4137_v35 = vpop.f32.mrf.mxu0 }
 0x3cd   :  { %v1910_v11 = vmax.f32 %v1749_v46, 0.0 }
 0x3ce   :  { %v4141_v10 = vpop.f32.mrf.mxu0 }
 0x3cf   :  { %v1755_v19 = vadd.f32 %v4141_v10, %v4089_v42 }
 0x3d0   :  { %v4143_v59 = vpop.f32.mrf.mxu0 }
 0x3d2   :  { %v4147_v34 = vpop.f32.mrf.mxu0 }
 0x3d3   :  { %v1761_v47 = vadd.f32 %v4147_v34, %v4091_v20 }
 0x3d4   :  { %v4151_v7 = vpop.f32.mrf.mxu0 }
 0x3d6   :  { %v4153_v13 = vpop.f32.mrf.mxu0 }
 0x3d7   :  { %v1767_v23 = vadd.f32 %v4153_v13, %v4093_v53 }
 0x3d8   :  { %v4157_v63 = vpop.f32.mrf.mxu0 }
 0x3d9   :  { %v1916_v46 = vmax.f32 %v1767_v23, 0.0 }
 0x3da   :  { %v4161_v49 = vpop.f32.mrf.mxu0 }
 0x3dc   :  { %v4163_v58 = vpop.f32.mrf.mxu0 }
 0x3de   :  { %v4167_v9 = vpop.f32.mrf.mxu0 }
 0x3e0   :  { %v4172_v3 = vpop.f32.mrf.mxu0 }
 0x3e2   :  { %v4177_v22 = vpop.f32.mrf.mxu0 }
 0x3e3   :  { %4488 = vst [vmem:[#allocation32_spill] sm:$0xff] %v4177_v22 }
 0x3e4   :  { %v4184_v26 = vpop.f32.mrf.mxu0 }
 0x3e6   :  { %v4190_v22 = vpop.f32.mrf.mxu0 }
 0x3e7   :  { %4491 = vst [vmem:[#allocation30_spill] sm:$0xff] %v4190_v22  ;;  %v2152_v22 = vmul.f32 %v1994_v18, %v1896_v2  ;;  %v1747_v18 = vadd.f32 %v4131_v38, %v4087_v12  ;;  %v1753_v2 = vadd.f32 %v4137_v35, %v4089_v42  ;;  %v2217_v38 = vadd.f32 %v2216_v5, %v2157_v24 }
 0x3e8   :  { %v4193_v1 = vpop.f32.mrf.mxu0  ;;  %v1759_v35 = vadd.f32 %v4143_v59, %v4091_v20  ;;  %v1765_v42 = vadd.f32 %v4151_v7, %v4093_v53  ;;  %v2164_v59 = vmul.f32 %v4149_v31, %v1908_v14  ;;  %v1912_v24 = vmax.f32 %v1755_v19, 0.0 }
 0x3e9   :  { %v2252_v56 = vadd.f32 %v2154_v43, %v2152_v22  ;;  %v2160_v22 = vmul.f32 %v4139_v4, %v1904_v32  ;;  %v1909_v30 = vmax.f32 %v1747_v18, 0.0  ;;  %v2218_v21 = vadd.f32 %v2217_v38, %v2159_v51 }
 0x3ea   :  { %v4198_v54 = vpop.f32.mrf.mxu0  ;;  %v2162_v4 = vmul.f32 %v4145_v8, %v1906_v36  ;;  %v1911_v57 = vmax.f32 %v1753_v2, 0.0  ;;  %v4243_v8 = vpop.permute.xlu1 %2078  ;;  %v1913_v32 = vmax.f32 %v1759_v35, 0.0  ;;  %v1771_v20 = vadd.f32 %v4157_v63, %v4095_v45 }
 0x3eb   :  { %v2253_v41 = vadd.f32 %v2252_v56, %v2156_v62  ;;  %v2219_v29 = vadd.f32 %v2218_v21, %v2161_v37  ;;  %v2165_v62 = vmul.f32 %v4155_v44, %v1909_v30  ;;  %v2166_v18 = vmul.f32 %v4155_v44, %v1910_v11  ;;  %v4253_v56 = vpop.permute.xlu0 %2083  ;;  %v4492_v21 = vld [vmem:[#allocation32_spill] sm:$0xff]  ;;  %v4494_v11 = vld [vmem:[#allocation31_spill] sm:$0xff] }
 0x3ec   :  { %v4205_v50 = vpop.f32.mrf.mxu0  ;;  %v2167_v31 = vmul.f32 %v4159_v25, %v1911_v57  ;;  %v1914_v5 = vmax.f32 %v1761_v47, 0.0  ;;  %v1773_v51 = vadd.f32 %v4161_v49, %v4095_v45  ;;  %v1777_v53 = vadd.f32 %v4163_v58, %v4097_v28 }
 0x3ed   :  { %v2254_v12 = vadd.f32 %v2253_v41, %v2158_v52  ;;  %v2220_v33 = vadd.f32 %v2219_v29, %v2163_v61  ;;  %v1915_v52 = vmax.f32 %v1765_v42, 0.0  ;;  %v2168_v17 = vmul.f32 %v4159_v25, %v1912_v24 }
 0x3ee   :  { %v4213_v55 = vpop.f32.mrf.mxu0  ;;  %v2169_v44 = vmul.f32 %v4165_v48, %v1913_v32  ;;  %v1917_v2 = vmax.f32 %v1771_v20, 0.0  ;;  %v1779_v41 = vadd.f32 %v4167_v9, %v4097_v28  ;;  %v1783_v49 = vadd.f32 %v4172_v3, %v4099_v27  ;;  %v4269_v58 = vpop.permute.xlu1 %2088  ;;  %v4493_v9 = vld [vmem:[#allocation41_spill] sm:$0xff]  ;;  %v4495_v42 = vld [vmem:[#allocation30_spill] sm:$0xff]  ;;  %v4497_v32 = vld [vmem:[#allocation11_spill] sm:$0xff] }
 0x3ef   :  { %v2255_v39 = vadd.f32 %v2254_v12, %v2160_v22  ;;  %v2221_v36 = vadd.f32 %v2220_v33, %v2165_v62  ;;  %v2170_v37 = vmul.f32 %v4165_v48, %v1914_v5  ;;  %v2171_v25 = vmul.f32 %v4169_v6, %v1915_v52 }
 0x3f0   :  { %v4222_v0 = vpop.f32.mrf.mxu0  ;;  %v1918_v14 = vmax.f32 %v1773_v51, 0.0  ;;  %v1919_v30 = vmax.f32 %v1777_v53, 0.0  ;;  %v1785_v28 = vadd.f32 %v4492_v21, %v4099_v27  ;;  %v1789_v35 = vadd.f32 %v4184_v26, %v4493_v9 }
 0x3f1   :  { %v2256_v7 = vadd.f32 %v2255_v39, %v2162_v4  ;;  %v2222_v45 = vadd.f32 %v2221_v36, %v2167_v31  ;;  %v4277_v4 = vpop.permute.xlu0 %2093  ;;  %v2172_v3 = vmul.f32 %v4169_v6, %v1916_v46  ;;  %v2173_v57 = vmul.f32 %v4494_v11, %v1917_v2 }
 0x3f2   :  { %v4231_v43 = vpop.f32.mrf.mxu0  ;;  %v1920_v48 = vmax.f32 %v1779_v41, 0.0  ;;  %v1921_v47 = vmax.f32 %v1783_v49, 0.0  ;;  %v1791_v29 = vadd.f32 %v4495_v42, %v4493_v9  ;;  %v2174_v26 = vmul.f32 %v4494_v11, %v1918_v14  ;;  %v4291_v5 = vpop.permute.xlu1 %2098  ;;  %v4499_v41 = vld [vmem:[#allocation39_spill] sm:$0xff]  ;;  %v4501_v11 = vld [vmem:[#allocation38_spill] sm:$0xff] }
 0x3f3   :  { %v2257_v63 = vadd.f32 %v2256_v7, %v2164_v59  ;;  %v2223_v61 = vadd.f32 %v2222_v45, %v2169_v44  ;;  %v4496_v59 = vld [vmem:[#allocation6_spill] sm:$0xff]  ;;  %v2175_v23 = vmul.f32 %v4497_v32, %v1919_v30  ;;  %v1922_v7 = vmax.f32 %v1785_v28, 0.0 }
 0x3f4   :  { %v4239_v10 = vpop.f32.mrf.mxu0  ;;  %v1795_v62 = vadd.f32 %v4193_v1, %v4496_v59  ;;  %v1923_v6 = vmax.f32 %v1789_v35, 0.0  ;;  %v1797_v33 = vadd.f32 %v4198_v54, %v4496_v59  ;;  %v2176_v1 = vmul.f32 %v4497_v32, %v1920_v48 }
 0x3f5   :  { %v2258_v22 = vadd.f32 %v2257_v63, %v2166_v18  ;;  %v2224_v24 = vadd.f32 %v2223_v61, %v2171_v25  ;;  %v4498_v18 = vld [vmem:[#allocation40_spill] sm:$0xff]  ;;  %v2177_v63 = vmul.f32 %v4196_v40, %v1921_v47  ;;  %v1924_v36 = vmax.f32 %v1791_v29, 0.0  ;;  %v4297_v46 = vpop.permute.xlu0 %2103 }
 0x3f6   :  { %v4249_v34 = vpop.f32.mrf.mxu0  ;;  %v1801_v31 = vadd.f32 %v4205_v50, %v4498_v18  ;;  %v1803_v44 = vadd.f32 %v4213_v55, %v4498_v18  ;;  %v1807_v50 = vadd.f32 %v4222_v0, %v4499_v41  ;;  %v2178_v45 = vmul.f32 %v4196_v40, %v1922_v7  ;;  %v4309_v61 = vpop.permute.xlu1 %2108 }
 0x3f7   :  { %v2259_v12 = vadd.f32 %v2258_v22, %v2168_v17  ;;  %v2225_v51 = vadd.f32 %v2224_v24, %v2173_v57  ;;  %v1925_v17 = vmax.f32 %v1795_v62, 0.0  ;;  %v2179_v49 = vmul.f32 %v4202_v60, %v1923_v6 }
 0x3f8   :  { %v4259_v13 = vpop.f32.mrf.mxu0  ;;  %v1927_v25 = vmax.f32 %v1801_v31, 0.0  ;;  %v1809_v30 = vadd.f32 %v4231_v43, %v4499_v41  ;;  %v2180_v9 = vmul.f32 %v4202_v60, %v1924_v36  ;;  %v1928_v35 = vmax.f32 %v1803_v44, 0.0 }
 0x3f9   :  { %v2260_v27 = vadd.f32 %v2259_v12, %v2170_v37  ;;  %v2226_v2 = vadd.f32 %v2225_v51, %v2175_v23  ;;  %v1926_v37 = vmax.f32 %v1797_v33, 0.0  ;;  %v4500_v12 = vld [vmem:[#allocation7_spill] sm:$0xff]  ;;  %v2181_v0 = vmul.f32 %v4219_v16, %v1925_v17  ;;  %v4317_v60 = vpop.permute.xlu0 %2113 }
 0x3fa   :  { %v4265_v38 = vpop.f32.mrf.mxu0  ;;  %v1813_v55 = vadd.f32 %v4239_v10, %v4500_v12  ;;  %v1929_v40 = vmax.f32 %v1807_v50, 0.0  ;;  %v1819_v57 = vadd.f32 %v4259_v13, %v4501_v11  ;;  %v2183_v42 = vmul.f32 %v4227_v15, %v1927_v25  ;;  %v4505_v25 = vld [vmem:[#allocation35_spill] sm:$0xff] }
 0x3fb   :  { %v2261_v52 = vadd.f32 %v2260_v27, %v2172_v3  ;;  %v2227_v28 = vadd.f32 %v2226_v2, %v2177_v63  ;;  %v1815_v3 = vadd.f32 %v4249_v34, %v4500_v12  ;;  %v2182_v10 = vmul.f32 %v4219_v16, %v1926_v37  ;;  %v4502_v27 = vld [vmem:[#allocation37_spill] sm:$0xff] }
 0x3fc   :  { %v1824_v19 = vpop.f32.mrf.mxu0  ;;  %v1930_v29 = vmax.f32 %v1809_v30, 0.0  ;;  %v1931_v59 = vmax.f32 %v1813_v55, 0.0  ;;  %v1821_v62 = vadd.f32 %v4265_v38, %v4501_v11  ;;  %v2184_v13 = vmul.f32 %v4227_v15, %v1928_v35 }
 0x3fd   :  { %v2262_v54 = vadd.f32 %v2261_v52, %v2174_v26  ;;  %v2228_v47 = vadd.f32 %v2227_v28, %v2179_v49  ;;  %v1825_v24 = vadd.f32 %v1824_v19, %v4502_v27  ;;  %v2185_v23 = vmul.f32 %v4243_v8, %v1929_v40  ;;  %v4503_v52 = vld [vmem:[#allocation8_spill] sm:$0xff] }
 0x3fe   :  { %v1826_v39 = vpop.f32.mrf.mxu0  ;;  %v1932_v7 = vmax.f32 %v1815_v3, 0.0  ;;  %v1933_v16 = vmax.f32 %v1819_v57, 0.0  ;;  %v2186_v38 = vmul.f32 %v4243_v8, %v1930_v29  ;;  %v2187_v19 = vmul.f32 %v4253_v56, %v1931_v59  ;;  %v4507_v59 = vld [vmem:[#allocation34_spill] sm:$0xff] }
 0x3ff   :  { %v2263_v14 = vadd.f32 %v2262_v54, %v2176_v1  ;;  %v2229_v32 = vadd.f32 %v2228_v47, %v2181_v0  ;;  %v1827_v6 = vadd.f32 %v1826_v39, %v4502_v27  ;;  %v4326_v1 = vpop.permute.xlu1 %2118  ;;  %v1934_v63 = vmax.f32 %v1821_v62, 0.0  ;;  %v4504_v54 = vld [vmem:[#allocation36_spill] sm:$0xff]  ;;  %v4332_v39 = vpop.permute.xlu0 %1620  ;;  %v4506_v0 = vld [vmem:[#allocation9_spill] sm:$0xff] }
 0x400   :  { %v1830_v20 = vpop.f32.mrf.mxu0  ;;  %v1935_v36 = vmax.f32 %v1825_v24, 0.0  ;;  %v2188_v50 = vmul.f32 %v4253_v56, %v1932_v7 }
 0x401   :  { %v2264_v48 = vadd.f32 %v2263_v14, %v2178_v45  ;;  %v2230_v31 = vadd.f32 %v2229_v32, %v2183_v42  ;;  %v1831_v51 = vadd.f32 %v1830_v20, %v4503_v52  ;;  %v2189_v20 = vmul.f32 %v4269_v58, %v1933_v16 }
 0x402   :  { %v1832_v53 = vpop.f32.mrf.mxu0  ;;  %v1936_v45 = vmax.f32 %v1827_v6, 0.0 }
 0x403   :  { %v2265_v26 = vadd.f32 %v2264_v48, %v2180_v9  ;;  %v1833_v44 = vadd.f32 %v1832_v53, %v4503_v52  ;;  %v2231_v41 = vadd.f32 %v2230_v31, %v2185_v23  ;;  %v1937_v8 = vmax.f32 %v1831_v51, 0.0  ;;  %v2124_v40 = vpop.permute.xlu1 %2123  ;;  %v4508_v23 = vld [vmem:[#allocation33_spill] sm:$0xff] }
 0x404   :  { %v1836_v22 = vpop.f32.mrf.mxu0  ;;  %v2190_v53 = vmul.f32 %v4269_v58, %v1934_v63 }
 0x405   :  { %v2266_v18 = vadd.f32 %v2265_v26, %v2182_v10  ;;  %v1837_v2 = vadd.f32 %v1836_v22, %v4504_v54  ;;  %v2232_v12 = vadd.f32 %v2231_v41, %v2187_v19  ;;  %v2191_v22 = vmul.f32 %v4277_v4, %v1935_v36  ;;  %v1626_v10 = vpop.permute.xlu0 %1625 }
 0x406   :  { %v1838_v21 = vpop.f32.mrf.mxu0  ;;  %v1938_v28 = vmax.f32 %v1833_v44, 0.0 }
 0x407   :  { %v2267_v17 = vadd.f32 %v2266_v18, %v2184_v13  ;;  %v1839_v37 = vadd.f32 %v1838_v21, %v4504_v54  ;;  %v1939_v9 = vmax.f32 %v1837_v2, 0.0  ;;  %v2233_v11 = vadd.f32 %v2232_v12, %v2189_v20  ;;  %v2129_v52 = vpop.permute.xlu1 %2128 }
 0x408   :  { %v1842_v43 = vpop.f32.mrf.mxu0  ;;  %v2192_v21 = vmul.f32 %v4277_v4, %v1936_v45  ;;  %v2194_v24 = vmul.f32 %v4291_v5, %v1938_v28 }
 0x409   :  { %v1843_v14 = vadd.f32 %v1842_v43, %v4505_v25  ;;  %v2268_v30 = vadd.f32 %v2267_v17, %v2186_v38  ;;  %v2193_v43 = vmul.f32 %v4291_v5, %v1937_v8  ;;  %v1940_v48 = vmax.f32 %v1839_v37, 0.0  ;;  %v4509_v38 = vld [vmem:[#allocation10_spill] sm:$0xff]  ;;  %v1631_v54 = vpop.permute.xlu0 %1630 }
 0x40a   :  { %v1844_v34 = vpop.f32.mrf.mxu0  ;;  %v2234_v29 = vadd.f32 %v2233_v11, %v2191_v22 }
 0x40b   :  { %v1845_v56 = vadd.f32 %v1844_v34, %v4505_v25  ;;  %v2269_v3 = vadd.f32 %v2268_v30, %v2188_v50  ;;  %v1941_v47 = vmax.f32 %v1843_v14, 0.0  ;;  %v2195_v34 = vmul.f32 %v4297_v46, %v1939_v9  ;;  %v2134_v22 = vpop.permute.xlu1 %2133 }
 0x40c   :  { %v1848_v33 = vpop.f32.mrf.mxu0  ;;  %v2235_v6 = vadd.f32 %v2234_v29, %v2193_v43 }
 0x40d   :  { %v1849_v35 = vadd.f32 %v1848_v33, %v4506_v0  ;;  %v2270_v42 = vadd.f32 %v2269_v3, %v2190_v53  ;;  %v1942_v26 = vmax.f32 %v1845_v56, 0.0  ;;  %v2196_v33 = vmul.f32 %v4297_v46, %v1940_v48  ;;  %v1636_v3 = vpop.permute.xlu0 %1635 }
 0x40e   :  { %v1850_v15 = vpop.f32.mrf.mxu0  ;;  %v2197_v18 = vmul.f32 %v4309_v61, %v1941_v47 }
 0x40f   :  { %v1851_v58 = vadd.f32 %v1850_v15, %v4506_v0  ;;  %v1943_v32 = vmax.f32 %v1849_v35, 0.0  ;;  %v2271_v4 = vadd.f32 %v2270_v42, %v2192_v21  ;;  %v2236_v15 = vadd.f32 %v2235_v6, %v2195_v34 }
 0x410   :  { %v1854_v49 = vpop.f32.mrf.mxu0  ;;  %v2198_v17 = vmul.f32 %v4309_v61, %v1942_v26 }
 0x411   :  { %v1855_v62 = vadd.f32 %v1854_v49, %v4507_v59  ;;  %v1944_v31 = vmax.f32 %v1851_v58, 0.0  ;;  %v2272_v36 = vadd.f32 %v2271_v4, %v2194_v24  ;;  %v2199_v44 = vmul.f32 %v4317_v60, %v1943_v32  ;;  %v2139_v24 = vpop.permute.xlu1 %2138 }
 0x412   :  { %v1856_v55 = vpop.f32.mrf.mxu0  ;;  %v2237_v45 = vadd.f32 %v2236_v15, %v2197_v18 }
 0x413   :  { %v1857_v13 = vadd.f32 %v1856_v55, %v4507_v59  ;;  %v1945_v51 = vmax.f32 %v1855_v62, 0.0  ;;  %v2273_v20 = vadd.f32 %v2272_v36, %v2196_v33  ;;  %v2200_v49 = vmul.f32 %v4317_v60, %v1944_v31 }
 0x414   :  { %v1860_v57 = vpop.f32.mrf.mxu0  ;;  %v2238_v12 = vadd.f32 %v2237_v45, %v2199_v44 }
 0x415   :  { %v1861_v7 = vadd.f32 %v1860_v57, %v4508_v23  ;;  %v1946_v2 = vmax.f32 %v1857_v13, 0.0  ;;  %v2201_v37 = vmul.f32 %v4326_v1, %v1945_v51  ;;  %v2274_v61 = vadd.f32 %v2273_v20, %v2198_v17  ;;  %v2149_v15 = vpop.permute.xlu1 %2148 }
 0x416   :  { %v1862_v27 = vpop.f32.mrf.mxu0  ;;  %v2295_v20 = vlaneseq }
 0x417   :  { %v1863_v5 = vadd.f32 %v1862_v27, %v4508_v23  ;;  %v1947_v41 = vmax.f32 %v1861_v7, 0.0  ;;  %v2202_v55 = vmul.f32 %v4326_v1, %v1946_v2  ;;  %v2275_v35 = vadd.f32 %v2274_v61, %v2200_v49  ;;  %v2144_v7 = vpop.permute.xlu0 %2143 }
 0x418   :  { %v1866_v16 = vpop.f32.mrf.mxu0  ;;  %v2239_v11 = vadd.f32 %v2238_v12, %v2201_v37  ;;  %vm2321_vm1 = vcmp.lt.s32.totalorder %v2295_v20, 256 }
 0x419   :  { %v1867_v19 = vadd.f32 %v1866_v16, %v4509_v38  ;;  %v1948_v25 = vmax.f32 %v1863_v5, 0.0  ;;  %v2203_v28 = vmul.f32 %v2124_v40, %v1947_v41  ;;  %v2276_v42 = vadd.f32 %v2275_v35, %v2202_v55 }
 0x41a   :  { %v1868_v63 = vpop.f32.mrf.mxu0 }
 0x41b   :  { %v1869_v46 = vadd.f32 %v1868_v63, %v4509_v38  ;;  %v1949_v14 = vmax.f32 %v1867_v19, 0.0  ;;  %v2204_v21 = vmul.f32 %v2124_v40, %v1948_v25  ;;  %v2240_v29 = vadd.f32 %v2239_v11, %v2203_v28 }
 0x41c   :  { %v1872_v50 = vpop.f32.mrf.mxu0  ;;  %v2296_v25 = vshrl.u32 %v2295_v20, 7 }
 0x41d   :  { %v1873_v8 = vadd.f32 %v1872_v50, %v4332_v39  ;;  %v1950_v9 = vmax.f32 %v1869_v46, 0.0  ;;  %v2205_v57 = vmul.f32 %v2129_v52, %v1949_v14  ;;  %v2277_v34 = vadd.f32 %v2276_v42, %v2204_v21 }
 0x41e   :  { %v1874_v30 = vpop.f32.mrf.mxu0  ;;  %v2297_v55 = vsub.s32 0, %v2296_v25 }
 0x41f   :  { %v1875_v53 = vadd.f32 %v1874_v30, %v4332_v39  ;;  %v1951_v56 = vmax.f32 %v1873_v8, 0.0  ;;  %v2206_v39 = vmul.f32 %v2129_v52, %v1950_v9  ;;  %v2241_v26 = vadd.f32 %v2240_v29, %v2205_v57 }
 0x420   :  { %v1878_v0 = vpop.f32.mrf.mxu0 }
 0x421   :  { %v1879_v60 = vadd.f32 %v1878_v0, %v1626_v10  ;;  %v1952_v43 = vmax.f32 %v1875_v53, 0.0  ;;  %v2207_v59 = vmul.f32 %v2134_v22, %v1951_v56  ;;  %v2278_v16 = vadd.f32 %v2277_v34, %v2206_v39  ;;  %v2293_v56 = vpop.permute.xlu0 %2292 }
 0x422   :  { %v1880_v48 = vpop.f32.mrf.mxu0  ;;  %v2558_v53 = vmov 1966171168  }
 0x423   :  { %v1953_v47 = vmax.f32 %v1879_v60, 0.0  ;;  %v1881_v58 = vadd.f32 %v1880_v48, %v1626_v10  ;;  %v2208_v32 = vmul.f32 %v2134_v22, %v1952_v43  ;;  %v2242_v6 = vadd.f32 %v2241_v26, %v2207_v59 }
 0x424   :  { %v1884_v62 = vpop.f32.mrf.mxu0  ;;  %v2305_v22 = vunpack.c.l.s4 %v2558_v53 }
 0x425   :  { %v1954_v1 = vmax.f32 %v1881_v58, 0.0  ;;  %v1885_v27 = vadd.f32 %v1884_v62, %v1631_v54  ;;  %v2209_v13 = vmul.f32 %v2139_v24, %v1953_v47  ;;  %v2279_v51 = vadd.f32 %v2278_v16, %v2208_v32 }
 0x426   :  { %v1886_v4 = vpop.f32.mrf.mxu0  ;;  %v2306_v60 = vunpack.c.0.s8 %v2305_v22 }
 0x427   :  { %v1955_v23 = vmax.f32 %v1885_v27, 0.0  ;;  %v1887_v40 = vadd.f32 %v1886_v4, %v1631_v54  ;;  %v2210_v10 = vmul.f32 %v2139_v24, %v1954_v1  ;;  %v2243_v38 = vadd.f32 %v2242_v6, %v2209_v13 }
 0x428   :  { %v1890_v33 = vpop.f32.mrf.mxu0  ;;  %v2309_v43 = vsub.s32 %v2306_v60, %v2296_v25 }
 0x429   :  { %v2211_v18 = vmul.f32 %v2144_v7, %v1955_v23  ;;  %v1956_v31 = vmax.f32 %v1887_v40, 0.0  ;;  %v1891_v52 = vadd.f32 %v1890_v33, %v1636_v3  ;;  %v2280_v17 = vadd.f32 %v2279_v51, %v2210_v10 }
 0x42a   :  { %v1892_v5 = vpop.f32.mrf.mxu0 }
 0x42b   :  { %v2212_v19 = vmul.f32 %v2144_v7, %v1956_v31  ;;  %v1957_v63 = vmax.f32 %v1891_v52, 0.0  ;;  %v1893_v36 = vadd.f32 %v1892_v5, %v1636_v3  ;;  %v2244_v44 = vadd.f32 %v2243_v38, %v2211_v18 }
 0x42c   :  { %v2298_v3 = vrot.slane %v2293_v56, %v2297_v55 }
 0x42d   :  { %v2213_v2 = vmul.f32 %v2149_v15, %v1957_v63  ;;  %v1958_v41 = vmax.f32 %v1893_v36, 0.0  ;;  %v2281_v54 = vadd.f32 %v2280_v17, %v2212_v19 }
 0x42f   :  { %v2245_v46 = vadd.f32 %v2244_v44, %v2213_v2  ;;  %v2214_v50 = vmul.f32 %v2149_v15, %v1958_v41 }
 0x431   :  { %v2246_v45 = vrot.slane %v2245_v46, 4  ;;  %v2282_v49 = vadd.f32 %v2281_v54, %v2214_v50 }
 0x433   :  { %v2247_v8 = vadd.f32 %v2246_v45, %v2245_v46  ;;  %v2283_v37 = vrot.slane %v2282_v49, 4 }
 0x435   :  { %v2248_v14 = vrot.slane %v2247_v8, 2  ;;  %v2284_v30 = vadd.f32 %v2283_v37, %v2282_v49 }
 0x437   :  { %v2249_v61 = vadd.f32 %v2248_v14, %v2247_v8  ;;  %v2285_v12 = vrot.slane %v2284_v30, 2 }
 0x439   :  { %v2250_v28 = vrot.slane %v2249_v61, 1  ;;  %v2286_v9 = vadd.f32 %v2285_v12, %v2284_v30 }
 0x43b   :  { %v2251_v0 = vadd.f32 %v2250_v28, %v2249_v61  ;;  %v2287_v35 = vrot.slane %v2286_v9, 1 }
 0x43d   :  { %v2288_v11 = vadd.f32 %v2287_v35, %v2286_v9  ;;  %v2299_v21 = vadd.f32 %v2298_v3, %v2251_v0 }
 0x43f   :  { %v2300_v57 = vadd.f32 %v2298_v3, %v2288_v11 }
 0x441   :  { %v2303_v48 = vcombine.low %v2299_v21, %v2300_v57 }
 0x443   :  { %v2310_v47 = vrot.slane %v2303_v48, %v2309_v43 }
 0x445   :  { %v2317_v58 = vrot.slane %v2310_v47, %v2309_v43 }
 0x447   :  { %2323 = vst.msk [vmem:[#allocation3] sm:$0x3] %vm2321_vm1, %v2317_v58 }
 0x448   :  { %2546 = shalt.err (!%p2543_p4)
}
 0x449   :  { %2333 = dma.vmem_to_hbm [thread:$0]  %s2331_s12, 32, %s4374_s9, [#allocation4]  }
 0x44a   :  { %2555 = dma.done.wait [#allocation4], 32  }
 0x44b   :  { %2556 = vsyncadd [#allocation4], 4294967264 }
 0x44c   :  { %2337 = vsyncpa [#allocation4], 1 }

</bundles_post_ra>
